<compile_context>
chip_gen: v5e
topology: v5e:2x2
jax: 0.10.0
libtpu: 0.0.40
codegen_flags: <defaults>
</compile_context>

<pallas_src>
import functools

import jax
import jax.numpy as jnp
from jax.experimental import pallas as pl
from jax.experimental.pallas import tpu as pltpu

K = 7
P = (K - 1) // 2


def _attention_gate_kernel(w_ref, b_ref, x_ref, o_ref, z_ref, s_ref, *,
                           H, W, Bt, C, Cc):
    # w_ref : SMEM (2*K*K,) BN-folded conv weights, flattened [c, ky, kx]
    #         (mean channel already carries the 1/C factor).
    # b_ref : SMEM (1,) BN-folded bias.
    # x_ref : VMEM block (Bt, C, H*W) lane-dense input.
    # o_ref : VMEM block (Bt, C, H*W) gated output.
    # z_ref : VMEM scratch (2, Bt, Lp) zero-padded flattened ZPool maps
    #         (samples on the sublane axis -> batched conv).
    # s_ref : VMEM scratch (Bt, H*W) sigmoid scale.
    HW = H * W
    J = HW + (K - 1) * W          # length of a kx-shifted working row
    pad0 = P * W + P              # flat offset of z[.., 0] inside a padded row

    # Zero the padded scratch once per grid step; interiors are overwritten per
    # sample, the borders stay zero and provide the conv's zero padding for
    # out-of-range rows.
    z_ref[...] = jnp.zeros_like(z_ref)

    def foreach_sample(body):
        if Bt <= 8:
            for b in range(Bt):          # fully unrolled, all-static indices
                body(b)
        else:
            pl.loop(0, Bt)(body)         # dynamic loop for large batch tiles

    # ---- Phase 1: ZPool (channel max + channel sum), channel-chunked ----
    def zpool_body(b):
        xc = x_ref[b, pl.ds(0, Cc), :]
        zmax = jnp.max(xc, axis=0, keepdims=True)
        zsum = jnp.sum(xc.astype(jnp.float32), axis=0, keepdims=True)
        for c0 in range(Cc, C, Cc):
            cc = min(Cc, C - c0)
            xc = x_ref[b, pl.ds(c0, cc), :]
            zmax = jnp.maximum(zmax, jnp.max(xc, axis=0, keepdims=True))
            zsum = zsum + jnp.sum(xc.astype(jnp.float32), axis=0, keepdims=True)
        z_ref[0, pl.ds(b, 1), pl.ds(pad0, HW)] = zmax.astype(jnp.float32)
        z_ref[1, pl.ds(b, 1), pl.ds(pad0, HW)] = zsum

    foreach_sample(zpool_body)

    # ---- Phase 2: 7x7 conv (2 -> 1), stride 1, pad 3, batched over sublanes ----
    # Column-validity masks for the flattened conv, generated in-kernel:
    # a kx term contributes to output column w only if 0 <= w + kx - P < W.
    col = jax.lax.broadcasted_iota(jnp.int32, (1, J), 1) % W
    mrow = []
    for kx in range(K):
        d = kx - P
        mrow.append(((col + d >= 0) & (col + d < W)).astype(jnp.float32))

    for s0 in range(0, Bt, 8):                     # 8-sample sublane groups
        sb = min(8, Bt - s0)
        racc = [jnp.zeros((sb, J), jnp.float32) for _ in range(K)]
        for c in range(2):
            for kx in range(K):
                u = z_ref[c, s0:s0 + sb, kx:kx + J]          # (sb, J)
                if kx != P:                                   # mask is all-ones at kx==P
                    u = u * mrow[kx]
                for ky in range(K):
                    racc[ky] = racc[ky] + w_ref[c * K * K + ky * K + kx] * u
        acc = jnp.zeros((sb, HW), jnp.float32)
        for ky in range(K):
            acc = acc + racc[ky][:, ky * W:ky * W + HW]       # lane slice per ky
        # Folded BatchNorm bias + sigmoid.
        s_ref[s0:s0 + sb, :] = jax.nn.sigmoid(acc + b_ref[0])

    # ---- Phase 3: gating pass, re-reading x from VMEM in channel chunks ----
    def gate_body(b):
        sc = s_ref[pl.ds(b, 1), :].astype(x_ref.dtype)        # (1, HW)
        for c0 in range(0, C, Cc):
            cc = min(Cc, C - c0)
            xc = x_ref[b, pl.ds(c0, cc), :]
            o_ref[b, pl.ds(c0, cc), :] = (xc * sc).astype(o_ref.dtype)

    foreach_sample(gate_body)


def attention_gate(x, conv_w, gamma, beta, run_mean, run_var, eps=1e-5):
    """x: (N, C, H, W); conv_w: (1, 2, K, K); BN params: shape (1,) (eval mode)."""
    N, C, H, W = x.shape
    HW = H * W
    pad0 = P * W + P
    Lp = HW + 2 * pad0

    # TODO(synk): BatchNorm is implemented in inference mode (running statistics),
    # folded into the conv weights; training-mode batch statistics are not modeled.
    s = gamma / jnp.sqrt(run_var + eps)                               # (1,)
    w_fold = conv_w.astype(jnp.float32) * s.reshape(1, 1, 1, 1)       # BN scale fold
    w_fold = w_fold * jnp.array([1.0, 1.0 / C], jnp.float32).reshape(1, 2, 1, 1)
    b_fold = (beta - run_mean * s).astype(jnp.float32)                # (1,)
    w_flat = w_fold.reshape(-1)                                       # (2*K*K,)

    # Lane-dense view of x; no host-side spatial padding.
    x2 = x.reshape(N, C, HW)

    # ---- Chip-aware block sizing ----
    try:
        vmem_cap = int(pltpu.get_tpu_info().vmem_capacity_bytes)
    except Exception:
        vmem_cap = 64 * 1024 * 1024
    # 48 MiB limit on 128 MiB chips (v5e/v6e), 32 MiB on 64 MiB chips (v7x).
    vmem_limit = int(min(max(vmem_cap // 2, 32 * 1024 * 1024), 48 * 1024 * 1024))
    # Per sample: in + out blocks (each double-buffered) + z/scale scratch.
    per_sample = 4 * C * HW * x.dtype.itemsize + (2 * Lp + HW) * 4
    Bt = max(1, min(N, (vmem_limit * 2 // 3) // per_sample, 128))

    # v7x has 2 TensorCores per chip: keep >= 2 grid steps so both get work.
    # Single-TC v5e/v6e: use the largest block that fits instead.
    kind = str(getattr(jax.devices()[0], "device_kind", "")).lower()
    if "v7" in kind and N >= 2:
        Bt = min(Bt, (N + 1) // 2)

    grid = (N + Bt - 1) // Bt
    N_pad = grid * Bt
    if N_pad != N:
        x2 = jnp.pad(x2, ((0, N_pad - N), (0, 0), (0, 0)))

    # Channel chunk for the ZPool / gating passes (bounds vreg live range).
    Cc = max(1, min(C, (16 * 1024) // max(HW, 1)))

    kernel = functools.partial(_attention_gate_kernel,
                               H=H, W=W, Bt=Bt, C=C, Cc=Cc)
    grid_spec = pltpu.PrefetchScalarGridSpec(
        num_scalar_prefetch=0,
        grid=(grid,),
        in_specs=[
            pl.BlockSpec(memory_space=pltpu.MemorySpace.SMEM),        # folded weights
            pl.BlockSpec(memory_space=pltpu.MemorySpace.SMEM),        # folded bias
            pl.BlockSpec((Bt, C, HW), lambda n: (n, 0, 0)),           # x, lane-dense
        ],
        out_specs=pl.BlockSpec((Bt, C, HW), lambda n: (n, 0, 0)),
        scratch_shapes=[
            pltpu.VMEM((2, Bt, Lp), jnp.float32),                     # padded z maps
            pltpu.VMEM((Bt, HW), jnp.float32),                        # sigmoid scale
        ],
    )
    out = pl.pallas_call(
        kernel,
        out_shape=jax.ShapeDtypeStruct((N_pad, C, HW), x.dtype),
        grid_spec=grid_spec,
        compiler_params=pltpu.CompilerParams(
            dimension_semantics=("parallel",),
            vmem_limit_bytes=vmem_limit,
        ),
    )(w_flat, b_fold, x2)
    return out[:N].reshape(N, C, H, W)


def _reference(x, conv_w, gamma, beta, run_mean, run_var, eps=1e-5):
    """Pure-JAX reference matching the PyTorch forward (BN in eval mode)."""
    z = jnp.concatenate(
        [jnp.max(x, axis=1, keepdims=True), jnp.mean(x, axis=1, keepdims=True)],
        axis=1,
    )
    y = jax.lax.conv_general_dilated(
        z, conv_w, window_strides=(1, 1), padding=[(P, P), (P, P)],
        dimension_numbers=("NCHW", "OIHW", "NCHW"),
    )
    g = gamma.reshape(1, -1, 1, 1)
    b = beta.reshape(1, -1, 1, 1)
    m = run_mean.reshape(1, -1, 1, 1)
    v = run_var.reshape(1, -1, 1, 1)
    y = (y - m) / jnp.sqrt(v + eps) * g + b
    return x * jax.nn.sigmoid(y)


if __name__ == "__main__":
    key = jax.random.PRNGKey(0)
    k1, k2, k3, k4, k5, k6 = jax.random.split(key, 6)

    N, C, H, W = 2, 4, 16, 16
    x = jax.random.normal(k1, (N, C, H, W), jnp.float32)

    # Deterministic synthetic parameters (shapes from the module __init__).
    conv_w = 0.1 * jax.random.normal(k2, (1, 2, K, K), jnp.float32)   # Conv2d(2,1,7), bias=False
    gamma = 1.0 + 0.1 * jax.random.normal(k3, (1,), jnp.float32)      # BatchNorm2d(1) weight
    beta = 0.1 * jax.random.normal(k4, (1,), jnp.float32)             # BatchNorm2d(1) bias
    run_mean = 0.1 * jax.random.normal(k5, (1,), jnp.float32)
    run_var = 1.0 + 0.1 * jnp.abs(jax.random.normal(k6, (1,), jnp.float32))

    out = attention_gate(x, conv_w, gamma, beta, run_mean, run_var)
    out = jax.block_until_ready(out)

    ref = _reference(x, conv_w, gamma, beta, run_mean, run_var)
    if not bool(jnp.allclose(out, ref, atol=2e-5, rtol=2e-5)):
        max_err = float(jnp.max(jnp.abs(out - ref)))
        raise AssertionError(f"Pallas kernel mismatch vs reference, max abs err = {max_err}")

    print("KERNEL_OK")
</pallas_src>

<mosaic_0001>
module attributes {stable_mosaic.version = 11 : i64} {
  func.func @_attention_gate_kernel(%arg0: i32, %arg1: memref<98xf32, #tpu.memory_space<smem>>, %arg2: memref<1xf32, #tpu.memory_space<smem>>, %arg3: memref<2x4x256xf32, #tpu.memory_space<vmem>>, %arg4: memref<2x4x256xf32, #tpu.memory_space<vmem>>, %arg5: memref<2x2x358xf32, #tpu.memory_space<vmem>>, %arg6: memref<2x256xf32, #tpu.memory_space<vmem>>) attributes {dimension_semantics = [#tpu.dimension_semantics<parallel>], iteration_bounds = array<i64: 1>, scalar_prefetch = 0 : i64, scratch_operands = 2 : i64, tpu.core_type = #tpu.core_type<tc>, window_params = [{transform_indices = @transform_0, window_bounds = array<i64: 98>}, {transform_indices = @transform_1, window_bounds = array<i64: 1>}, {transform_indices = @transform_2, window_bounds = array<i64: 2, 4, 256>}, {transform_indices = @transform_3, window_bounds = array<i64: 2, 4, 256>}]} {
    %cst = arith.constant 0.000000e+00 : f32
    %0 = vector.broadcast %cst : f32 to vector<2x2x358xf32>
    %c0 = arith.constant 0 : index
    %c0_0 = arith.constant 0 : index
    %c0_1 = arith.constant 0 : index
    %1 = vector.load %arg5[%c0, %c0_0, %c0_1] : memref<2x2x358xf32, #tpu.memory_space<vmem>>, vector<2x2x358xf32>
    tpu.vector_store %arg5[%c0, %c0_0, %c0_1], %0 {strides = array<i32>} : memref<2x2x358xf32, #tpu.memory_space<vmem>>, vector<2x2x358xf32>,
    %c0_2 = arith.constant 0 : index
    %c0_3 = arith.constant 0 : index
    %c0_4 = arith.constant 0 : index
    %2 = vector.load %arg3[%c0_2, %c0_3, %c0_4] : memref<2x4x256xf32, #tpu.memory_space<vmem>>, vector<1x4x256xf32>
    %3 = vector.shape_cast %2 : vector<1x4x256xf32> to vector<4x256xf32>
    %cst_5 = arith.constant dense<0xFF800000> : vector<256xf32>
    %4 = vector.multi_reduction <maximumf>, %3, %cst_5 [0] : vector<4x256xf32> to vector<256xf32>
    %5 = vector.shape_cast %4 : vector<256xf32> to vector<1x256xf32>
    %cst_6 = arith.constant dense<0.000000e+00> : vector<256xf32>
    %6 = vector.multi_reduction <add>, %3, %cst_6 [0] : vector<4x256xf32> to vector<256xf32>
    %7 = vector.shape_cast %6 : vector<256xf32> to vector<1x256xf32>
    %c0_7 = arith.constant 0 : index
    %c0_8 = arith.constant 0 : index
    %c51 = arith.constant 51 : index
    %8 = vector.load %arg5[%c0_7, %c0_8, %c51] : memref<2x2x358xf32, #tpu.memory_space<vmem>>, vector<1x1x256xf32>
    %9 = vector.shape_cast %8 : vector<1x1x256xf32> to vector<1x256xf32>
    %10 = vector.shape_cast %5 : vector<1x256xf32> to vector<1x1x256xf32>
    tpu.vector_store %arg5[%c0_7, %c0_8, %c51], %10 {strides = array<i32>} : memref<2x2x358xf32, #tpu.memory_space<vmem>>, vector<1x1x256xf32>,
    %c1 = arith.constant 1 : index
    %c0_9 = arith.constant 0 : index
    %c51_10 = arith.constant 51 : index
    %11 = vector.load %arg5[%c1, %c0_9, %c51_10] : memref<2x2x358xf32, #tpu.memory_space<vmem>>, vector<1x1x256xf32>
    %12 = vector.shape_cast %11 : vector<1x1x256xf32> to vector<1x256xf32>
    %13 = vector.shape_cast %7 : vector<1x256xf32> to vector<1x1x256xf32>
    tpu.vector_store %arg5[%c1, %c0_9, %c51_10], %13 {strides = array<i32>} : memref<2x2x358xf32, #tpu.memory_space<vmem>>, vector<1x1x256xf32>,
    %c1_11 = arith.constant 1 : index
    %c0_12 = arith.constant 0 : index
    %c0_13 = arith.constant 0 : index
    %14 = vector.load %arg3[%c1_11, %c0_12, %c0_13] : memref<2x4x256xf32, #tpu.memory_space<vmem>>, vector<1x4x256xf32>
    %15 = vector.shape_cast %14 : vector<1x4x256xf32> to vector<4x256xf32>
    %cst_14 = arith.constant dense<0xFF800000> : vector<256xf32>
    %16 = vector.multi_reduction <maximumf>, %15, %cst_14 [0] : vector<4x256xf32> to vector<256xf32>
    %17 = vector.shape_cast %16 : vector<256xf32> to vector<1x256xf32>
    %cst_15 = arith.constant dense<0.000000e+00> : vector<256xf32>
    %18 = vector.multi_reduction <add>, %15, %cst_15 [0] : vector<4x256xf32> to vector<256xf32>
    %19 = vector.shape_cast %18 : vector<256xf32> to vector<1x256xf32>
    %c0_16 = arith.constant 0 : index
    %c1_17 = arith.constant 1 : index
    %c51_18 = arith.constant 51 : index
    %20 = vector.load %arg5[%c0_16, %c1_17, %c51_18] : memref<2x2x358xf32, #tpu.memory_space<vmem>>, vector<1x1x256xf32>
    %21 = vector.shape_cast %20 : vector<1x1x256xf32> to vector<1x256xf32>
    %22 = vector.shape_cast %17 : vector<1x256xf32> to vector<1x1x256xf32>
    tpu.vector_store %arg5[%c0_16, %c1_17, %c51_18], %22 {strides = array<i32>} : memref<2x2x358xf32, #tpu.memory_space<vmem>>, vector<1x1x256xf32>,
    %c1_19 = arith.constant 1 : index
    %c1_20 = arith.constant 1 : index
    %c51_21 = arith.constant 51 : index
    %23 = vector.load %arg5[%c1_19, %c1_20, %c51_21] : memref<2x2x358xf32, #tpu.memory_space<vmem>>, vector<1x1x256xf32>
    %24 = vector.shape_cast %23 : vector<1x1x256xf32> to vector<1x256xf32>
    %25 = vector.shape_cast %19 : vector<1x256xf32> to vector<1x1x256xf32>
    tpu.vector_store %arg5[%c1_19, %c1_20, %c51_21], %25 {strides = array<i32>} : memref<2x2x358xf32, #tpu.memory_space<vmem>>, vector<1x1x256xf32>,
    %26 = tpu.iota {dimensions = array<i32: 1>} : vector<1x352xi32>
    %c16_i32 = arith.constant 16 : i32
    %c0_i32 = arith.constant 0 : i32
    %27 = arith.cmpi eq, %c16_i32, %c0_i32 : i32
    %c1_i32 = arith.constant 1 : i32
    %28 = arith.select %27, %c1_i32, %c16_i32 : i32
    %29 = vector.broadcast %28 : i32 to vector<1x352xi32>
    %30 = arith.remsi %26, %29 : vector<1x352xi32>
    %c0_i32_22 = arith.constant 0 : i32
    %31 = vector.broadcast %c0_i32_22 : i32 to vector<1x352xi32>
    %32 = arith.cmpi ne, %30, %31 : vector<1x352xi32>
    %c0_i32_23 = arith.constant 0 : i32
    %33 = vector.broadcast %c0_i32_23 : i32 to vector<1x352xi32>
    %34 = arith.cmpi slt, %30, %33 : vector<1x352xi32>
    %c0_i32_24 = arith.constant 0 : i32
    %35 = arith.cmpi slt, %28, %c0_i32_24 : i32
    %36 = vector.broadcast %35 : i1 to vector<1x352xi1>
    %37 = vector.broadcast %36 : vector<1x352xi1> to vector<1x352xi1>
    %38 = arith.xori %34, %37 : vector<1x352xi1>
    %39 = arith.andi %38, %32 : vector<1x352xi1>
    %40 = vector.broadcast %28 : i32 to vector<1x352xi32>
    %41 = arith.addi %30, %40 : vector<1x352xi32>
    %42 = arith.select %39, %41, %30 : vector<1x352xi1>, vector<1x352xi32>
    %c-3_i32 = arith.constant -3 : i32
    %43 = vector.broadcast %c-3_i32 : i32 to vector<1x352xi32>
    %44 = arith.addi %42, %43 : vector<1x352xi32>
    %c0_i32_25 = arith.constant 0 : i32
    %45 = vector.broadcast %c0_i32_25 : i32 to vector<1x352xi32>
    %46 = arith.cmpi sge, %44, %45 : vector<1x352xi32>
    %c-3_i32_26 = arith.constant -3 : i32
    %47 = vector.broadcast %c-3_i32_26 : i32 to vector<1x352xi32>
    %48 = arith.addi %42, %47 : vector<1x352xi32>
    %c16_i32_27 = arith.constant 16 : i32
    %49 = vector.broadcast %c16_i32_27 : i32 to vector<1x352xi32>
    %50 = arith.cmpi slt, %48, %49 : vector<1x352xi32>
    %51 = arith.andi %46, %50 : vector<1x352xi1>
    %52 = arith.extui %51 : vector<1x352xi1> to vector<1x352xi32>
    %53 = arith.sitofp %52 : vector<1x352xi32> to vector<1x352xf32>
    %c-2_i32 = arith.constant -2 : i32
    %54 = vector.broadcast %c-2_i32 : i32 to vector<1x352xi32>
    %55 = arith.addi %42, %54 : vector<1x352xi32>
    %c0_i32_28 = arith.constant 0 : i32
    %56 = vector.broadcast %c0_i32_28 : i32 to vector<1x352xi32>
    %57 = arith.cmpi sge, %55, %56 : vector<1x352xi32>
    %c-2_i32_29 = arith.constant -2 : i32
    %58 = vector.broadcast %c-2_i32_29 : i32 to vector<1x352xi32>
    %59 = arith.addi %42, %58 : vector<1x352xi32>
    %c16_i32_30 = arith.constant 16 : i32
    %60 = vector.broadcast %c16_i32_30 : i32 to vector<1x352xi32>
    %61 = arith.cmpi slt, %59, %60 : vector<1x352xi32>
    %62 = arith.andi %57, %61 : vector<1x352xi1>
    %63 = arith.extui %62 : vector<1x352xi1> to vector<1x352xi32>
    %64 = arith.sitofp %63 : vector<1x352xi32> to vector<1x352xf32>
    %c-1_i32 = arith.constant -1 : i32
    %65 = vector.broadcast %c-1_i32 : i32 to vector<1x352xi32>
    %66 = arith.addi %42, %65 : vector<1x352xi32>
    %c0_i32_31 = arith.constant 0 : i32
    %67 = vector.broadcast %c0_i32_31 : i32 to vector<1x352xi32>
    %68 = arith.cmpi sge, %66, %67 : vector<1x352xi32>
    %c-1_i32_32 = arith.constant -1 : i32
    %69 = vector.broadcast %c-1_i32_32 : i32 to vector<1x352xi32>
    %70 = arith.addi %42, %69 : vector<1x352xi32>
    %c16_i32_33 = arith.constant 16 : i32
    %71 = vector.broadcast %c16_i32_33 : i32 to vector<1x352xi32>
    %72 = arith.cmpi slt, %70, %71 : vector<1x352xi32>
    %73 = arith.andi %68, %72 : vector<1x352xi1>
    %74 = arith.extui %73 : vector<1x352xi1> to vector<1x352xi32>
    %75 = arith.sitofp %74 : vector<1x352xi32> to vector<1x352xf32>
    %c1_i32_34 = arith.constant 1 : i32
    %76 = vector.broadcast %c1_i32_34 : i32 to vector<1x352xi32>
    %77 = arith.addi %42, %76 : vector<1x352xi32>
    %c0_i32_35 = arith.constant 0 : i32
    %78 = vector.broadcast %c0_i32_35 : i32 to vector<1x352xi32>
    %79 = arith.cmpi sge, %77, %78 : vector<1x352xi32>
    %c1_i32_36 = arith.constant 1 : i32
    %80 = vector.broadcast %c1_i32_36 : i32 to vector<1x352xi32>
    %81 = arith.addi %42, %80 : vector<1x352xi32>
    %c16_i32_37 = arith.constant 16 : i32
    %82 = vector.broadcast %c16_i32_37 : i32 to vector<1x352xi32>
    %83 = arith.cmpi slt, %81, %82 : vector<1x352xi32>
    %84 = arith.andi %79, %83 : vector<1x352xi1>
    %85 = arith.extui %84 : vector<1x352xi1> to vector<1x352xi32>
    %86 = arith.sitofp %85 : vector<1x352xi32> to vector<1x352xf32>
    %c2_i32 = arith.constant 2 : i32
    %87 = vector.broadcast %c2_i32 : i32 to vector<1x352xi32>
    %88 = arith.addi %42, %87 : vector<1x352xi32>
    %c0_i32_38 = arith.constant 0 : i32
    %89 = vector.broadcast %c0_i32_38 : i32 to vector<1x352xi32>
    %90 = arith.cmpi sge, %88, %89 : vector<1x352xi32>
    %c2_i32_39 = arith.constant 2 : i32
    %91 = vector.broadcast %c2_i32_39 : i32 to vector<1x352xi32>
    %92 = arith.addi %42, %91 : vector<1x352xi32>
    %c16_i32_40 = arith.constant 16 : i32
    %93 = vector.broadcast %c16_i32_40 : i32 to vector<1x352xi32>
    %94 = arith.cmpi slt, %92, %93 : vector<1x352xi32>
    %95 = arith.andi %90, %94 : vector<1x352xi1>
    %96 = arith.extui %95 : vector<1x352xi1> to vector<1x352xi32>
    %97 = arith.sitofp %96 : vector<1x352xi32> to vector<1x352xf32>
    %c3_i32 = arith.constant 3 : i32
    %98 = vector.broadcast %c3_i32 : i32 to vector<1x352xi32>
    %99 = arith.addi %42, %98 : vector<1x352xi32>
    %c0_i32_41 = arith.constant 0 : i32
    %100 = vector.broadcast %c0_i32_41 : i32 to vector<1x352xi32>
    %101 = arith.cmpi sge, %99, %100 : vector<1x352xi32>
    %c3_i32_42 = arith.constant 3 : i32
    %102 = vector.broadcast %c3_i32_42 : i32 to vector<1x352xi32>
    %103 = arith.addi %42, %102 : vector<1x352xi32>
    %c16_i32_43 = arith.constant 16 : i32
    %104 = vector.broadcast %c16_i32_43 : i32 to vector<1x352xi32>
    %105 = arith.cmpi slt, %103, %104 : vector<1x352xi32>
    %106 = arith.andi %101, %105 : vector<1x352xi1>
    %107 = arith.extui %106 : vector<1x352xi1> to vector<1x352xi32>
    %108 = arith.sitofp %107 : vector<1x352xi32> to vector<1x352xf32>
    %cst_44 = arith.constant 0.000000e+00 : f32
    %109 = vector.broadcast %cst_44 : f32 to vector<2x352xf32>
    %cst_45 = arith.constant 0.000000e+00 : f32
    %110 = vector.broadcast %cst_45 : f32 to vector<2x352xf32>
    %cst_46 = arith.constant 0.000000e+00 : f32
    %111 = vector.broadcast %cst_46 : f32 to vector<2x352xf32>
    %cst_47 = arith.constant 0.000000e+00 : f32
    %112 = vector.broadcast %cst_47 : f32 to vector<2x352xf32>
    %cst_48 = arith.constant 0.000000e+00 : f32
    %113 = vector.broadcast %cst_48 : f32 to vector<2x352xf32>
    %cst_49 = arith.constant 0.000000e+00 : f32
    %114 = vector.broadcast %cst_49 : f32 to vector<2x352xf32>
    %cst_50 = arith.constant 0.000000e+00 : f32
    %115 = vector.broadcast %cst_50 : f32 to vector<2x352xf32>
    %c0_51 = arith.constant 0 : index
    %c0_52 = arith.constant 0 : index
    %c0_53 = arith.constant 0 : index
    %116 = vector.load %arg5[%c0_51, %c0_52, %c0_53] : memref<2x2x358xf32, #tpu.memory_space<vmem>>, vector<1x2x352xf32>
    %117 = vector.shape_cast %116 : vector<1x2x352xf32> to vector<2x352xf32>
    %118 = vector.broadcast %53 : vector<1x352xf32> to vector<2x352xf32>
    %119 = arith.mulf %117, %118 : vector<2x352xf32>
    %c0_54 = arith.constant 0 : index
    %120 = memref.load %arg1[%c0_54] : memref<98xf32, #tpu.memory_space<smem>>
    %121 = vector.broadcast %120 : f32 to vector<2x352xf32>
    %122 = arith.mulf %121, %119 : vector<2x352xf32>
    %123 = arith.addf %109, %122 : vector<2x352xf32>
    %c7 = arith.constant 7 : index
    %124 = memref.load %arg1[%c7] : memref<98xf32, #tpu.memory_space<smem>>
    %125 = vector.broadcast %124 : f32 to vector<2x352xf32>
    %126 = arith.mulf %125, %119 : vector<2x352xf32>
    %127 = arith.addf %110, %126 : vector<2x352xf32>
    %c14 = arith.constant 14 : index
    %128 = memref.load %arg1[%c14] : memref<98xf32, #tpu.memory_space<smem>>
    %129 = vector.broadcast %128 : f32 to vector<2x352xf32>
    %130 = arith.mulf %129, %119 : vector<2x352xf32>
    %131 = arith.addf %111, %130 : vector<2x352xf32>
    %c21 = arith.constant 21 : index
    %132 = memref.load %arg1[%c21] : memref<98xf32, #tpu.memory_space<smem>>
    %133 = vector.broadcast %132 : f32 to vector<2x352xf32>
    %134 = arith.mulf %133, %119 : vector<2x352xf32>
    %135 = arith.addf %112, %134 : vector<2x352xf32>
    %c28 = arith.constant 28 : index
    %136 = memref.load %arg1[%c28] : memref<98xf32, #tpu.memory_space<smem>>
    %137 = vector.broadcast %136 : f32 to vector<2x352xf32>
    %138 = arith.mulf %137, %119 : vector<2x352xf32>
    %139 = arith.addf %113, %138 : vector<2x352xf32>
    %c35 = arith.constant 35 : index
    %140 = memref.load %arg1[%c35] : memref<98xf32, #tpu.memory_space<smem>>
    %141 = vector.broadcast %140 : f32 to vector<2x352xf32>
    %142 = arith.mulf %141, %119 : vector<2x352xf32>
    %143 = arith.addf %114, %142 : vector<2x352xf32>
    %c42 = arith.constant 42 : index
    %144 = memref.load %arg1[%c42] : memref<98xf32, #tpu.memory_space<smem>>
    %145 = vector.broadcast %144 : f32 to vector<2x352xf32>
    %146 = arith.mulf %145, %119 : vector<2x352xf32>
    %147 = arith.addf %115, %146 : vector<2x352xf32>
    %c0_55 = arith.constant 0 : index
    %c0_56 = arith.constant 0 : index
    %c1_57 = arith.constant 1 : index
    %148 = vector.load %arg5[%c0_55, %c0_56, %c1_57] : memref<2x2x358xf32, #tpu.memory_space<vmem>>, vector<1x2x352xf32>
    %149 = vector.shape_cast %148 : vector<1x2x352xf32> to vector<2x352xf32>
    %150 = vector.broadcast %64 : vector<1x352xf32> to vector<2x352xf32>
    %151 = arith.mulf %149, %150 : vector<2x352xf32>
    %c1_58 = arith.constant 1 : index
    %152 = memref.load %arg1[%c1_58] : memref<98xf32, #tpu.memory_space<smem>>
    %153 = vector.broadcast %152 : f32 to vector<2x352xf32>
    %154 = arith.mulf %153, %151 : vector<2x352xf32>
    %155 = arith.addf %123, %154 : vector<2x352xf32>
    %c8 = arith.constant 8 : index
    %156 = memref.load %arg1[%c8] : memref<98xf32, #tpu.memory_space<smem>>
    %157 = vector.broadcast %156 : f32 to vector<2x352xf32>
    %158 = arith.mulf %157, %151 : vector<2x352xf32>
    %159 = arith.addf %127, %158 : vector<2x352xf32>
    %c15 = arith.constant 15 : index
    %160 = memref.load %arg1[%c15] : memref<98xf32, #tpu.memory_space<smem>>
    %161 = vector.broadcast %160 : f32 to vector<2x352xf32>
    %162 = arith.mulf %161, %151 : vector<2x352xf32>
    %163 = arith.addf %131, %162 : vector<2x352xf32>
    %c22 = arith.constant 22 : index
    %164 = memref.load %arg1[%c22] : memref<98xf32, #tpu.memory_space<smem>>
    %165 = vector.broadcast %164 : f32 to vector<2x352xf32>
    %166 = arith.mulf %165, %151 : vector<2x352xf32>
    %167 = arith.addf %135, %166 : vector<2x352xf32>
    %c29 = arith.constant 29 : index
    %168 = memref.load %arg1[%c29] : memref<98xf32, #tpu.memory_space<smem>>
    %169 = vector.broadcast %168 : f32 to vector<2x352xf32>
    %170 = arith.mulf %169, %151 : vector<2x352xf32>
    %171 = arith.addf %139, %170 : vector<2x352xf32>
    %c36 = arith.constant 36 : index
    %172 = memref.load %arg1[%c36] : memref<98xf32, #tpu.memory_space<smem>>
    %173 = vector.broadcast %172 : f32 to vector<2x352xf32>
    %174 = arith.mulf %173, %151 : vector<2x352xf32>
    %175 = arith.addf %143, %174 : vector<2x352xf32>
    %c43 = arith.constant 43 : index
    %176 = memref.load %arg1[%c43] : memref<98xf32, #tpu.memory_space<smem>>
    %177 = vector.broadcast %176 : f32 to vector<2x352xf32>
    %178 = arith.mulf %177, %151 : vector<2x352xf32>
    %179 = arith.addf %147, %178 : vector<2x352xf32>
    %c0_59 = arith.constant 0 : index
    %c0_60 = arith.constant 0 : index
    %c2 = arith.constant 2 : index
    %180 = vector.load %arg5[%c0_59, %c0_60, %c2] : memref<2x2x358xf32, #tpu.memory_space<vmem>>, vector<1x2x352xf32>
    %181 = vector.shape_cast %180 : vector<1x2x352xf32> to vector<2x352xf32>
    %182 = vector.broadcast %75 : vector<1x352xf32> to vector<2x352xf32>
    %183 = arith.mulf %181, %182 : vector<2x352xf32>
    %c2_61 = arith.constant 2 : index
    %184 = memref.load %arg1[%c2_61] : memref<98xf32, #tpu.memory_space<smem>>
    %185 = vector.broadcast %184 : f32 to vector<2x352xf32>
    %186 = arith.mulf %185, %183 : vector<2x352xf32>
    %187 = arith.addf %155, %186 : vector<2x352xf32>
    %c9 = arith.constant 9 : index
    %188 = memref.load %arg1[%c9] : memref<98xf32, #tpu.memory_space<smem>>
    %189 = vector.broadcast %188 : f32 to vector<2x352xf32>
    %190 = arith.mulf %189, %183 : vector<2x352xf32>
    %191 = arith.addf %159, %190 : vector<2x352xf32>
    %c16 = arith.constant 16 : index
    %192 = memref.load %arg1[%c16] : memref<98xf32, #tpu.memory_space<smem>>
    %193 = vector.broadcast %192 : f32 to vector<2x352xf32>
    %194 = arith.mulf %193, %183 : vector<2x352xf32>
    %195 = arith.addf %163, %194 : vector<2x352xf32>
    %c23 = arith.constant 23 : index
    %196 = memref.load %arg1[%c23] : memref<98xf32, #tpu.memory_space<smem>>
    %197 = vector.broadcast %196 : f32 to vector<2x352xf32>
    %198 = arith.mulf %197, %183 : vector<2x352xf32>
    %199 = arith.addf %167, %198 : vector<2x352xf32>
    %c30 = arith.constant 30 : index
    %200 = memref.load %arg1[%c30] : memref<98xf32, #tpu.memory_space<smem>>
    %201 = vector.broadcast %200 : f32 to vector<2x352xf32>
    %202 = arith.mulf %201, %183 : vector<2x352xf32>
    %203 = arith.addf %171, %202 : vector<2x352xf32>
    %c37 = arith.constant 37 : index
    %204 = memref.load %arg1[%c37] : memref<98xf32, #tpu.memory_space<smem>>
    %205 = vector.broadcast %204 : f32 to vector<2x352xf32>
    %206 = arith.mulf %205, %183 : vector<2x352xf32>
    %207 = arith.addf %175, %206 : vector<2x352xf32>
    %c44 = arith.constant 44 : index
    %208 = memref.load %arg1[%c44] : memref<98xf32, #tpu.memory_space<smem>>
    %209 = vector.broadcast %208 : f32 to vector<2x352xf32>
    %210 = arith.mulf %209, %183 : vector<2x352xf32>
    %211 = arith.addf %179, %210 : vector<2x352xf32>
    %c0_62 = arith.constant 0 : index
    %c0_63 = arith.constant 0 : index
    %c3 = arith.constant 3 : index
    %212 = vector.load %arg5[%c0_62, %c0_63, %c3] : memref<2x2x358xf32, #tpu.memory_space<vmem>>, vector<1x2x352xf32>
    %213 = vector.shape_cast %212 : vector<1x2x352xf32> to vector<2x352xf32>
    %c3_64 = arith.constant 3 : index
    %214 = memref.load %arg1[%c3_64] : memref<98xf32, #tpu.memory_space<smem>>
    %215 = vector.broadcast %214 : f32 to vector<2x352xf32>
    %216 = arith.mulf %215, %213 : vector<2x352xf32>
    %217 = arith.addf %187, %216 : vector<2x352xf32>
    %c10 = arith.constant 10 : index
    %218 = memref.load %arg1[%c10] : memref<98xf32, #tpu.memory_space<smem>>
    %219 = vector.broadcast %218 : f32 to vector<2x352xf32>
    %220 = arith.mulf %219, %213 : vector<2x352xf32>
    %221 = arith.addf %191, %220 : vector<2x352xf32>
    %c17 = arith.constant 17 : index
    %222 = memref.load %arg1[%c17] : memref<98xf32, #tpu.memory_space<smem>>
    %223 = vector.broadcast %222 : f32 to vector<2x352xf32>
    %224 = arith.mulf %223, %213 : vector<2x352xf32>
    %225 = arith.addf %195, %224 : vector<2x352xf32>
    %c24 = arith.constant 24 : index
    %226 = memref.load %arg1[%c24] : memref<98xf32, #tpu.memory_space<smem>>
    %227 = vector.broadcast %226 : f32 to vector<2x352xf32>
    %228 = arith.mulf %227, %213 : vector<2x352xf32>
    %229 = arith.addf %199, %228 : vector<2x352xf32>
    %c31 = arith.constant 31 : index
    %230 = memref.load %arg1[%c31] : memref<98xf32, #tpu.memory_space<smem>>
    %231 = vector.broadcast %230 : f32 to vector<2x352xf32>
    %232 = arith.mulf %231, %213 : vector<2x352xf32>
    %233 = arith.addf %203, %232 : vector<2x352xf32>
    %c38 = arith.constant 38 : index
    %234 = memref.load %arg1[%c38] : memref<98xf32, #tpu.memory_space<smem>>
    %235 = vector.broadcast %234 : f32 to vector<2x352xf32>
    %236 = arith.mulf %235, %213 : vector<2x352xf32>
    %237 = arith.addf %207, %236 : vector<2x352xf32>
    %c45 = arith.constant 45 : index
    %238 = memref.load %arg1[%c45] : memref<98xf32, #tpu.memory_space<smem>>
    %239 = vector.broadcast %238 : f32 to vector<2x352xf32>
    %240 = arith.mulf %239, %213 : vector<2x352xf32>
    %241 = arith.addf %211, %240 : vector<2x352xf32>
    %c0_65 = arith.constant 0 : index
    %c0_66 = arith.constant 0 : index
    %c4 = arith.constant 4 : index
    %242 = vector.load %arg5[%c0_65, %c0_66, %c4] : memref<2x2x358xf32, #tpu.memory_space<vmem>>, vector<1x2x352xf32>
    %243 = vector.shape_cast %242 : vector<1x2x352xf32> to vector<2x352xf32>
    %244 = vector.broadcast %86 : vector<1x352xf32> to vector<2x352xf32>
    %245 = arith.mulf %243, %244 : vector<2x352xf32>
    %c4_67 = arith.constant 4 : index
    %246 = memref.load %arg1[%c4_67] : memref<98xf32, #tpu.memory_space<smem>>
    %247 = vector.broadcast %246 : f32 to vector<2x352xf32>
    %248 = arith.mulf %247, %245 : vector<2x352xf32>
    %249 = arith.addf %217, %248 : vector<2x352xf32>
    %c11 = arith.constant 11 : index
    %250 = memref.load %arg1[%c11] : memref<98xf32, #tpu.memory_space<smem>>
    %251 = vector.broadcast %250 : f32 to vector<2x352xf32>
    %252 = arith.mulf %251, %245 : vector<2x352xf32>
    %253 = arith.addf %221, %252 : vector<2x352xf32>
    %c18 = arith.constant 18 : index
    %254 = memref.load %arg1[%c18] : memref<98xf32, #tpu.memory_space<smem>>
    %255 = vector.broadcast %254 : f32 to vector<2x352xf32>
    %256 = arith.mulf %255, %245 : vector<2x352xf32>
    %257 = arith.addf %225, %256 : vector<2x352xf32>
    %c25 = arith.constant 25 : index
    %258 = memref.load %arg1[%c25] : memref<98xf32, #tpu.memory_space<smem>>
    %259 = vector.broadcast %258 : f32 to vector<2x352xf32>
    %260 = arith.mulf %259, %245 : vector<2x352xf32>
    %261 = arith.addf %229, %260 : vector<2x352xf32>
    %c32 = arith.constant 32 : index
    %262 = memref.load %arg1[%c32] : memref<98xf32, #tpu.memory_space<smem>>
    %263 = vector.broadcast %262 : f32 to vector<2x352xf32>
    %264 = arith.mulf %263, %245 : vector<2x352xf32>
    %265 = arith.addf %233, %264 : vector<2x352xf32>
    %c39 = arith.constant 39 : index
    %266 = memref.load %arg1[%c39] : memref<98xf32, #tpu.memory_space<smem>>
    %267 = vector.broadcast %266 : f32 to vector<2x352xf32>
    %268 = arith.mulf %267, %245 : vector<2x352xf32>
    %269 = arith.addf %237, %268 : vector<2x352xf32>
    %c46 = arith.constant 46 : index
    %270 = memref.load %arg1[%c46] : memref<98xf32, #tpu.memory_space<smem>>
    %271 = vector.broadcast %270 : f32 to vector<2x352xf32>
    %272 = arith.mulf %271, %245 : vector<2x352xf32>
    %273 = arith.addf %241, %272 : vector<2x352xf32>
    %c0_68 = arith.constant 0 : index
    %c0_69 = arith.constant 0 : index
    %c5 = arith.constant 5 : index
    %274 = vector.load %arg5[%c0_68, %c0_69, %c5] : memref<2x2x358xf32, #tpu.memory_space<vmem>>, vector<1x2x352xf32>
    %275 = vector.shape_cast %274 : vector<1x2x352xf32> to vector<2x352xf32>
    %276 = vector.broadcast %97 : vector<1x352xf32> to vector<2x352xf32>
    %277 = arith.mulf %275, %276 : vector<2x352xf32>
    %c5_70 = arith.constant 5 : index
    %278 = memref.load %arg1[%c5_70] : memref<98xf32, #tpu.memory_space<smem>>
    %279 = vector.broadcast %278 : f32 to vector<2x352xf32>
    %280 = arith.mulf %279, %277 : vector<2x352xf32>
    %281 = arith.addf %249, %280 : vector<2x352xf32>
    %c12 = arith.constant 12 : index
    %282 = memref.load %arg1[%c12] : memref<98xf32, #tpu.memory_space<smem>>
    %283 = vector.broadcast %282 : f32 to vector<2x352xf32>
    %284 = arith.mulf %283, %277 : vector<2x352xf32>
    %285 = arith.addf %253, %284 : vector<2x352xf32>
    %c19 = arith.constant 19 : index
    %286 = memref.load %arg1[%c19] : memref<98xf32, #tpu.memory_space<smem>>
    %287 = vector.broadcast %286 : f32 to vector<2x352xf32>
    %288 = arith.mulf %287, %277 : vector<2x352xf32>
    %289 = arith.addf %257, %288 : vector<2x352xf32>
    %c26 = arith.constant 26 : index
    %290 = memref.load %arg1[%c26] : memref<98xf32, #tpu.memory_space<smem>>
    %291 = vector.broadcast %290 : f32 to vector<2x352xf32>
    %292 = arith.mulf %291, %277 : vector<2x352xf32>
    %293 = arith.addf %261, %292 : vector<2x352xf32>
    %c33 = arith.constant 33 : index
    %294 = memref.load %arg1[%c33] : memref<98xf32, #tpu.memory_space<smem>>
    %295 = vector.broadcast %294 : f32 to vector<2x352xf32>
    %296 = arith.mulf %295, %277 : vector<2x352xf32>
    %297 = arith.addf %265, %296 : vector<2x352xf32>
    %c40 = arith.constant 40 : index
    %298 = memref.load %arg1[%c40] : memref<98xf32, #tpu.memory_space<smem>>
    %299 = vector.broadcast %298 : f32 to vector<2x352xf32>
    %300 = arith.mulf %299, %277 : vector<2x352xf32>
    %301 = arith.addf %269, %300 : vector<2x352xf32>
    %c47 = arith.constant 47 : index
    %302 = memref.load %arg1[%c47] : memref<98xf32, #tpu.memory_space<smem>>
    %303 = vector.broadcast %302 : f32 to vector<2x352xf32>
    %304 = arith.mulf %303, %277 : vector<2x352xf32>
    %305 = arith.addf %273, %304 : vector<2x352xf32>
    %c0_71 = arith.constant 0 : index
    %c0_72 = arith.constant 0 : index
    %c6 = arith.constant 6 : index
    %306 = vector.load %arg5[%c0_71, %c0_72, %c6] : memref<2x2x358xf32, #tpu.memory_space<vmem>>, vector<1x2x352xf32>
    %307 = vector.shape_cast %306 : vector<1x2x352xf32> to vector<2x352xf32>
    %308 = vector.broadcast %108 : vector<1x352xf32> to vector<2x352xf32>
    %309 = arith.mulf %307, %308 : vector<2x352xf32>
    %c6_73 = arith.constant 6 : index
    %310 = memref.load %arg1[%c6_73] : memref<98xf32, #tpu.memory_space<smem>>
    %311 = vector.broadcast %310 : f32 to vector<2x352xf32>
    %312 = arith.mulf %311, %309 : vector<2x352xf32>
    %313 = arith.addf %281, %312 : vector<2x352xf32>
    %c13 = arith.constant 13 : index
    %314 = memref.load %arg1[%c13] : memref<98xf32, #tpu.memory_space<smem>>
    %315 = vector.broadcast %314 : f32 to vector<2x352xf32>
    %316 = arith.mulf %315, %309 : vector<2x352xf32>
    %317 = arith.addf %285, %316 : vector<2x352xf32>
    %c20 = arith.constant 20 : index
    %318 = memref.load %arg1[%c20] : memref<98xf32, #tpu.memory_space<smem>>
    %319 = vector.broadcast %318 : f32 to vector<2x352xf32>
    %320 = arith.mulf %319, %309 : vector<2x352xf32>
    %321 = arith.addf %289, %320 : vector<2x352xf32>
    %c27 = arith.constant 27 : index
    %322 = memref.load %arg1[%c27] : memref<98xf32, #tpu.memory_space<smem>>
    %323 = vector.broadcast %322 : f32 to vector<2x352xf32>
    %324 = arith.mulf %323, %309 : vector<2x352xf32>
    %325 = arith.addf %293, %324 : vector<2x352xf32>
    %c34 = arith.constant 34 : index
    %326 = memref.load %arg1[%c34] : memref<98xf32, #tpu.memory_space<smem>>
    %327 = vector.broadcast %326 : f32 to vector<2x352xf32>
    %328 = arith.mulf %327, %309 : vector<2x352xf32>
    %329 = arith.addf %297, %328 : vector<2x352xf32>
    %c41 = arith.constant 41 : index
    %330 = memref.load %arg1[%c41] : memref<98xf32, #tpu.memory_space<smem>>
    %331 = vector.broadcast %330 : f32 to vector<2x352xf32>
    %332 = arith.mulf %331, %309 : vector<2x352xf32>
    %333 = arith.addf %301, %332 : vector<2x352xf32>
    %c48 = arith.constant 48 : index
    %334 = memref.load %arg1[%c48] : memref<98xf32, #tpu.memory_space<smem>>
    %335 = vector.broadcast %334 : f32 to vector<2x352xf32>
    %336 = arith.mulf %335, %309 : vector<2x352xf32>
    %337 = arith.addf %305, %336 : vector<2x352xf32>
    %c1_74 = arith.constant 1 : index
    %c0_75 = arith.constant 0 : index
    %c0_76 = arith.constant 0 : index
    %338 = vector.load %arg5[%c1_74, %c0_75, %c0_76] : memref<2x2x358xf32, #tpu.memory_space<vmem>>, vector<1x2x352xf32>
    %339 = vector.shape_cast %338 : vector<1x2x352xf32> to vector<2x352xf32>
    %340 = vector.broadcast %53 : vector<1x352xf32> to vector<2x352xf32>
    %341 = arith.mulf %339, %340 : vector<2x352xf32>
    %c49 = arith.constant 49 : index
    %342 = memref.load %arg1[%c49] : memref<98xf32, #tpu.memory_space<smem>>
    %343 = vector.broadcast %342 : f32 to vector<2x352xf32>
    %344 = arith.mulf %343, %341 : vector<2x352xf32>
    %345 = arith.addf %313, %344 : vector<2x352xf32>
    %c56 = arith.constant 56 : index
    %346 = memref.load %arg1[%c56] : memref<98xf32, #tpu.memory_space<smem>>
    %347 = vector.broadcast %346 : f32 to vector<2x352xf32>
    %348 = arith.mulf %347, %341 : vector<2x352xf32>
    %349 = arith.addf %317, %348 : vector<2x352xf32>
    %c63 = arith.constant 63 : index
    %350 = memref.load %arg1[%c63] : memref<98xf32, #tpu.memory_space<smem>>
    %351 = vector.broadcast %350 : f32 to vector<2x352xf32>
    %352 = arith.mulf %351, %341 : vector<2x352xf32>
    %353 = arith.addf %321, %352 : vector<2x352xf32>
    %c70 = arith.constant 70 : index
    %354 = memref.load %arg1[%c70] : memref<98xf32, #tpu.memory_space<smem>>
    %355 = vector.broadcast %354 : f32 to vector<2x352xf32>
    %356 = arith.mulf %355, %341 : vector<2x352xf32>
    %357 = arith.addf %325, %356 : vector<2x352xf32>
    %c77 = arith.constant 77 : index
    %358 = memref.load %arg1[%c77] : memref<98xf32, #tpu.memory_space<smem>>
    %359 = vector.broadcast %358 : f32 to vector<2x352xf32>
    %360 = arith.mulf %359, %341 : vector<2x352xf32>
    %361 = arith.addf %329, %360 : vector<2x352xf32>
    %c84 = arith.constant 84 : index
    %362 = memref.load %arg1[%c84] : memref<98xf32, #tpu.memory_space<smem>>
    %363 = vector.broadcast %362 : f32 to vector<2x352xf32>
    %364 = arith.mulf %363, %341 : vector<2x352xf32>
    %365 = arith.addf %333, %364 : vector<2x352xf32>
    %c91 = arith.constant 91 : index
    %366 = memref.load %arg1[%c91] : memref<98xf32, #tpu.memory_space<smem>>
    %367 = vector.broadcast %366 : f32 to vector<2x352xf32>
    %368 = arith.mulf %367, %341 : vector<2x352xf32>
    %369 = arith.addf %337, %368 : vector<2x352xf32>
    %c1_77 = arith.constant 1 : index
    %c0_78 = arith.constant 0 : index
    %c1_79 = arith.constant 1 : index
    %370 = vector.load %arg5[%c1_77, %c0_78, %c1_79] : memref<2x2x358xf32, #tpu.memory_space<vmem>>, vector<1x2x352xf32>
    %371 = vector.shape_cast %370 : vector<1x2x352xf32> to vector<2x352xf32>
    %372 = vector.broadcast %64 : vector<1x352xf32> to vector<2x352xf32>
    %373 = arith.mulf %371, %372 : vector<2x352xf32>
    %c50 = arith.constant 50 : index
    %374 = memref.load %arg1[%c50] : memref<98xf32, #tpu.memory_space<smem>>
    %375 = vector.broadcast %374 : f32 to vector<2x352xf32>
    %376 = arith.mulf %375, %373 : vector<2x352xf32>
    %377 = arith.addf %345, %376 : vector<2x352xf32>
    %c57 = arith.constant 57 : index
    %378 = memref.load %arg1[%c57] : memref<98xf32, #tpu.memory_space<smem>>
    %379 = vector.broadcast %378 : f32 to vector<2x352xf32>
    %380 = arith.mulf %379, %373 : vector<2x352xf32>
    %381 = arith.addf %349, %380 : vector<2x352xf32>
    %c64 = arith.constant 64 : index
    %382 = memref.load %arg1[%c64] : memref<98xf32, #tpu.memory_space<smem>>
    %383 = vector.broadcast %382 : f32 to vector<2x352xf32>
    %384 = arith.mulf %383, %373 : vector<2x352xf32>
    %385 = arith.addf %353, %384 : vector<2x352xf32>
    %c71 = arith.constant 71 : index
    %386 = memref.load %arg1[%c71] : memref<98xf32, #tpu.memory_space<smem>>
    %387 = vector.broadcast %386 : f32 to vector<2x352xf32>
    %388 = arith.mulf %387, %373 : vector<2x352xf32>
    %389 = arith.addf %357, %388 : vector<2x352xf32>
    %c78 = arith.constant 78 : index
    %390 = memref.load %arg1[%c78] : memref<98xf32, #tpu.memory_space<smem>>
    %391 = vector.broadcast %390 : f32 to vector<2x352xf32>
    %392 = arith.mulf %391, %373 : vector<2x352xf32>
    %393 = arith.addf %361, %392 : vector<2x352xf32>
    %c85 = arith.constant 85 : index
    %394 = memref.load %arg1[%c85] : memref<98xf32, #tpu.memory_space<smem>>
    %395 = vector.broadcast %394 : f32 to vector<2x352xf32>
    %396 = arith.mulf %395, %373 : vector<2x352xf32>
    %397 = arith.addf %365, %396 : vector<2x352xf32>
    %c92 = arith.constant 92 : index
    %398 = memref.load %arg1[%c92] : memref<98xf32, #tpu.memory_space<smem>>
    %399 = vector.broadcast %398 : f32 to vector<2x352xf32>
    %400 = arith.mulf %399, %373 : vector<2x352xf32>
    %401 = arith.addf %369, %400 : vector<2x352xf32>
    %c1_80 = arith.constant 1 : index
    %c0_81 = arith.constant 0 : index
    %c2_82 = arith.constant 2 : index
    %402 = vector.load %arg5[%c1_80, %c0_81, %c2_82] : memref<2x2x358xf32, #tpu.memory_space<vmem>>, vector<1x2x352xf32>
    %403 = vector.shape_cast %402 : vector<1x2x352xf32> to vector<2x352xf32>
    %404 = vector.broadcast %75 : vector<1x352xf32> to vector<2x352xf32>
    %405 = arith.mulf %403, %404 : vector<2x352xf32>
    %c51_83 = arith.constant 51 : index
    %406 = memref.load %arg1[%c51_83] : memref<98xf32, #tpu.memory_space<smem>>
    %407 = vector.broadcast %406 : f32 to vector<2x352xf32>
    %408 = arith.mulf %407, %405 : vector<2x352xf32>
    %409 = arith.addf %377, %408 : vector<2x352xf32>
    %c58 = arith.constant 58 : index
    %410 = memref.load %arg1[%c58] : memref<98xf32, #tpu.memory_space<smem>>
    %411 = vector.broadcast %410 : f32 to vector<2x352xf32>
    %412 = arith.mulf %411, %405 : vector<2x352xf32>
    %413 = arith.addf %381, %412 : vector<2x352xf32>
    %c65 = arith.constant 65 : index
    %414 = memref.load %arg1[%c65] : memref<98xf32, #tpu.memory_space<smem>>
    %415 = vector.broadcast %414 : f32 to vector<2x352xf32>
    %416 = arith.mulf %415, %405 : vector<2x352xf32>
    %417 = arith.addf %385, %416 : vector<2x352xf32>
    %c72 = arith.constant 72 : index
    %418 = memref.load %arg1[%c72] : memref<98xf32, #tpu.memory_space<smem>>
    %419 = vector.broadcast %418 : f32 to vector<2x352xf32>
    %420 = arith.mulf %419, %405 : vector<2x352xf32>
    %421 = arith.addf %389, %420 : vector<2x352xf32>
    %c79 = arith.constant 79 : index
    %422 = memref.load %arg1[%c79] : memref<98xf32, #tpu.memory_space<smem>>
    %423 = vector.broadcast %422 : f32 to vector<2x352xf32>
    %424 = arith.mulf %423, %405 : vector<2x352xf32>
    %425 = arith.addf %393, %424 : vector<2x352xf32>
    %c86 = arith.constant 86 : index
    %426 = memref.load %arg1[%c86] : memref<98xf32, #tpu.memory_space<smem>>
    %427 = vector.broadcast %426 : f32 to vector<2x352xf32>
    %428 = arith.mulf %427, %405 : vector<2x352xf32>
    %429 = arith.addf %397, %428 : vector<2x352xf32>
    %c93 = arith.constant 93 : index
    %430 = memref.load %arg1[%c93] : memref<98xf32, #tpu.memory_space<smem>>
    %431 = vector.broadcast %430 : f32 to vector<2x352xf32>
    %432 = arith.mulf %431, %405 : vector<2x352xf32>
    %433 = arith.addf %401, %432 : vector<2x352xf32>
    %c1_84 = arith.constant 1 : index
    %c0_85 = arith.constant 0 : index
    %c3_86 = arith.constant 3 : index
    %434 = vector.load %arg5[%c1_84, %c0_85, %c3_86] : memref<2x2x358xf32, #tpu.memory_space<vmem>>, vector<1x2x352xf32>
    %435 = vector.shape_cast %434 : vector<1x2x352xf32> to vector<2x352xf32>
    %c52 = arith.constant 52 : index
    %436 = memref.load %arg1[%c52] : memref<98xf32, #tpu.memory_space<smem>>
    %437 = vector.broadcast %436 : f32 to vector<2x352xf32>
    %438 = arith.mulf %437, %435 : vector<2x352xf32>
    %439 = arith.addf %409, %438 : vector<2x352xf32>
    %c59 = arith.constant 59 : index
    %440 = memref.load %arg1[%c59] : memref<98xf32, #tpu.memory_space<smem>>
    %441 = vector.broadcast %440 : f32 to vector<2x352xf32>
    %442 = arith.mulf %441, %435 : vector<2x352xf32>
    %443 = arith.addf %413, %442 : vector<2x352xf32>
    %c66 = arith.constant 66 : index
    %444 = memref.load %arg1[%c66] : memref<98xf32, #tpu.memory_space<smem>>
    %445 = vector.broadcast %444 : f32 to vector<2x352xf32>
    %446 = arith.mulf %445, %435 : vector<2x352xf32>
    %447 = arith.addf %417, %446 : vector<2x352xf32>
    %c73 = arith.constant 73 : index
    %448 = memref.load %arg1[%c73] : memref<98xf32, #tpu.memory_space<smem>>
    %449 = vector.broadcast %448 : f32 to vector<2x352xf32>
    %450 = arith.mulf %449, %435 : vector<2x352xf32>
    %451 = arith.addf %421, %450 : vector<2x352xf32>
    %c80 = arith.constant 80 : index
    %452 = memref.load %arg1[%c80] : memref<98xf32, #tpu.memory_space<smem>>
    %453 = vector.broadcast %452 : f32 to vector<2x352xf32>
    %454 = arith.mulf %453, %435 : vector<2x352xf32>
    %455 = arith.addf %425, %454 : vector<2x352xf32>
    %c87 = arith.constant 87 : index
    %456 = memref.load %arg1[%c87] : memref<98xf32, #tpu.memory_space<smem>>
    %457 = vector.broadcast %456 : f32 to vector<2x352xf32>
    %458 = arith.mulf %457, %435 : vector<2x352xf32>
    %459 = arith.addf %429, %458 : vector<2x352xf32>
    %c94 = arith.constant 94 : index
    %460 = memref.load %arg1[%c94] : memref<98xf32, #tpu.memory_space<smem>>
    %461 = vector.broadcast %460 : f32 to vector<2x352xf32>
    %462 = arith.mulf %461, %435 : vector<2x352xf32>
    %463 = arith.addf %433, %462 : vector<2x352xf32>
    %c1_87 = arith.constant 1 : index
    %c0_88 = arith.constant 0 : index
    %c4_89 = arith.constant 4 : index
    %464 = vector.load %arg5[%c1_87, %c0_88, %c4_89] : memref<2x2x358xf32, #tpu.memory_space<vmem>>, vector<1x2x352xf32>
    %465 = vector.shape_cast %464 : vector<1x2x352xf32> to vector<2x352xf32>
    %466 = vector.broadcast %86 : vector<1x352xf32> to vector<2x352xf32>
    %467 = arith.mulf %465, %466 : vector<2x352xf32>
    %c53 = arith.constant 53 : index
    %468 = memref.load %arg1[%c53] : memref<98xf32, #tpu.memory_space<smem>>
    %469 = vector.broadcast %468 : f32 to vector<2x352xf32>
    %470 = arith.mulf %469, %467 : vector<2x352xf32>
    %471 = arith.addf %439, %470 : vector<2x352xf32>
    %c60 = arith.constant 60 : index
    %472 = memref.load %arg1[%c60] : memref<98xf32, #tpu.memory_space<smem>>
    %473 = vector.broadcast %472 : f32 to vector<2x352xf32>
    %474 = arith.mulf %473, %467 : vector<2x352xf32>
    %475 = arith.addf %443, %474 : vector<2x352xf32>
    %c67 = arith.constant 67 : index
    %476 = memref.load %arg1[%c67] : memref<98xf32, #tpu.memory_space<smem>>
    %477 = vector.broadcast %476 : f32 to vector<2x352xf32>
    %478 = arith.mulf %477, %467 : vector<2x352xf32>
    %479 = arith.addf %447, %478 : vector<2x352xf32>
    %c74 = arith.constant 74 : index
    %480 = memref.load %arg1[%c74] : memref<98xf32, #tpu.memory_space<smem>>
    %481 = vector.broadcast %480 : f32 to vector<2x352xf32>
    %482 = arith.mulf %481, %467 : vector<2x352xf32>
    %483 = arith.addf %451, %482 : vector<2x352xf32>
    %c81 = arith.constant 81 : index
    %484 = memref.load %arg1[%c81] : memref<98xf32, #tpu.memory_space<smem>>
    %485 = vector.broadcast %484 : f32 to vector<2x352xf32>
    %486 = arith.mulf %485, %467 : vector<2x352xf32>
    %487 = arith.addf %455, %486 : vector<2x352xf32>
    %c88 = arith.constant 88 : index
    %488 = memref.load %arg1[%c88] : memref<98xf32, #tpu.memory_space<smem>>
    %489 = vector.broadcast %488 : f32 to vector<2x352xf32>
    %490 = arith.mulf %489, %467 : vector<2x352xf32>
    %491 = arith.addf %459, %490 : vector<2x352xf32>
    %c95 = arith.constant 95 : index
    %492 = memref.load %arg1[%c95] : memref<98xf32, #tpu.memory_space<smem>>
    %493 = vector.broadcast %492 : f32 to vector<2x352xf32>
    %494 = arith.mulf %493, %467 : vector<2x352xf32>
    %495 = arith.addf %463, %494 : vector<2x352xf32>
    %c1_90 = arith.constant 1 : index
    %c0_91 = arith.constant 0 : index
    %c5_92 = arith.constant 5 : index
    %496 = vector.load %arg5[%c1_90, %c0_91, %c5_92] : memref<2x2x358xf32, #tpu.memory_space<vmem>>, vector<1x2x352xf32>
    %497 = vector.shape_cast %496 : vector<1x2x352xf32> to vector<2x352xf32>
    %498 = vector.broadcast %97 : vector<1x352xf32> to vector<2x352xf32>
    %499 = arith.mulf %497, %498 : vector<2x352xf32>
    %c54 = arith.constant 54 : index
    %500 = memref.load %arg1[%c54] : memref<98xf32, #tpu.memory_space<smem>>
    %501 = vector.broadcast %500 : f32 to vector<2x352xf32>
    %502 = arith.mulf %501, %499 : vector<2x352xf32>
    %503 = arith.addf %471, %502 : vector<2x352xf32>
    %c61 = arith.constant 61 : index
    %504 = memref.load %arg1[%c61] : memref<98xf32, #tpu.memory_space<smem>>
    %505 = vector.broadcast %504 : f32 to vector<2x352xf32>
    %506 = arith.mulf %505, %499 : vector<2x352xf32>
    %507 = arith.addf %475, %506 : vector<2x352xf32>
    %c68 = arith.constant 68 : index
    %508 = memref.load %arg1[%c68] : memref<98xf32, #tpu.memory_space<smem>>
    %509 = vector.broadcast %508 : f32 to vector<2x352xf32>
    %510 = arith.mulf %509, %499 : vector<2x352xf32>
    %511 = arith.addf %479, %510 : vector<2x352xf32>
    %c75 = arith.constant 75 : index
    %512 = memref.load %arg1[%c75] : memref<98xf32, #tpu.memory_space<smem>>
    %513 = vector.broadcast %512 : f32 to vector<2x352xf32>
    %514 = arith.mulf %513, %499 : vector<2x352xf32>
    %515 = arith.addf %483, %514 : vector<2x352xf32>
    %c82 = arith.constant 82 : index
    %516 = memref.load %arg1[%c82] : memref<98xf32, #tpu.memory_space<smem>>
    %517 = vector.broadcast %516 : f32 to vector<2x352xf32>
    %518 = arith.mulf %517, %499 : vector<2x352xf32>
    %519 = arith.addf %487, %518 : vector<2x352xf32>
    %c89 = arith.constant 89 : index
    %520 = memref.load %arg1[%c89] : memref<98xf32, #tpu.memory_space<smem>>
    %521 = vector.broadcast %520 : f32 to vector<2x352xf32>
    %522 = arith.mulf %521, %499 : vector<2x352xf32>
    %523 = arith.addf %491, %522 : vector<2x352xf32>
    %c96 = arith.constant 96 : index
    %524 = memref.load %arg1[%c96] : memref<98xf32, #tpu.memory_space<smem>>
    %525 = vector.broadcast %524 : f32 to vector<2x352xf32>
    %526 = arith.mulf %525, %499 : vector<2x352xf32>
    %527 = arith.addf %495, %526 : vector<2x352xf32>
    %c1_93 = arith.constant 1 : index
    %c0_94 = arith.constant 0 : index
    %c6_95 = arith.constant 6 : index
    %528 = vector.load %arg5[%c1_93, %c0_94, %c6_95] : memref<2x2x358xf32, #tpu.memory_space<vmem>>, vector<1x2x352xf32>
    %529 = vector.shape_cast %528 : vector<1x2x352xf32> to vector<2x352xf32>
    %530 = vector.broadcast %108 : vector<1x352xf32> to vector<2x352xf32>
    %531 = arith.mulf %529, %530 : vector<2x352xf32>
    %c55 = arith.constant 55 : index
    %532 = memref.load %arg1[%c55] : memref<98xf32, #tpu.memory_space<smem>>
    %533 = vector.broadcast %532 : f32 to vector<2x352xf32>
    %534 = arith.mulf %533, %531 : vector<2x352xf32>
    %535 = arith.addf %503, %534 : vector<2x352xf32>
    %c62 = arith.constant 62 : index
    %536 = memref.load %arg1[%c62] : memref<98xf32, #tpu.memory_space<smem>>
    %537 = vector.broadcast %536 : f32 to vector<2x352xf32>
    %538 = arith.mulf %537, %531 : vector<2x352xf32>
    %539 = arith.addf %507, %538 : vector<2x352xf32>
    %c69 = arith.constant 69 : index
    %540 = memref.load %arg1[%c69] : memref<98xf32, #tpu.memory_space<smem>>
    %541 = vector.broadcast %540 : f32 to vector<2x352xf32>
    %542 = arith.mulf %541, %531 : vector<2x352xf32>
    %543 = arith.addf %511, %542 : vector<2x352xf32>
    %c76 = arith.constant 76 : index
    %544 = memref.load %arg1[%c76] : memref<98xf32, #tpu.memory_space<smem>>
    %545 = vector.broadcast %544 : f32 to vector<2x352xf32>
    %546 = arith.mulf %545, %531 : vector<2x352xf32>
    %547 = arith.addf %515, %546 : vector<2x352xf32>
    %c83 = arith.constant 83 : index
    %548 = memref.load %arg1[%c83] : memref<98xf32, #tpu.memory_space<smem>>
    %549 = vector.broadcast %548 : f32 to vector<2x352xf32>
    %550 = arith.mulf %549, %531 : vector<2x352xf32>
    %551 = arith.addf %519, %550 : vector<2x352xf32>
    %c90 = arith.constant 90 : index
    %552 = memref.load %arg1[%c90] : memref<98xf32, #tpu.memory_space<smem>>
    %553 = vector.broadcast %552 : f32 to vector<2x352xf32>
    %554 = arith.mulf %553, %531 : vector<2x352xf32>
    %555 = arith.addf %523, %554 : vector<2x352xf32>
    %c97 = arith.constant 97 : index
    %556 = memref.load %arg1[%c97] : memref<98xf32, #tpu.memory_space<smem>>
    %557 = vector.broadcast %556 : f32 to vector<2x352xf32>
    %558 = arith.mulf %557, %531 : vector<2x352xf32>
    %559 = arith.addf %527, %558 : vector<2x352xf32>
    %cst_96 = arith.constant 0.000000e+00 : f32
    %560 = vector.broadcast %cst_96 : f32 to vector<2x256xf32>
    %561 = vector.extract_strided_slice %535 {offsets = [0, 0], sizes = [2, 256], strides = [1, 1]} : vector<2x352xf32> to vector<2x256xf32>
    %562 = arith.addf %560, %561 : vector<2x256xf32>
    %563 = vector.extract_strided_slice %539 {offsets = [0, 16], sizes = [2, 256], strides = [1, 1]} : vector<2x352xf32> to vector<2x256xf32>
    %564 = arith.addf %562, %563 : vector<2x256xf32>
    %565 = vector.extract_strided_slice %543 {offsets = [0, 32], sizes = [2, 256], strides = [1, 1]} : vector<2x352xf32> to vector<2x256xf32>
    %566 = arith.addf %564, %565 : vector<2x256xf32>
    %567 = vector.extract_strided_slice %547 {offsets = [0, 48], sizes = [2, 256], strides = [1, 1]} : vector<2x352xf32> to vector<2x256xf32>
    %568 = arith.addf %566, %567 : vector<2x256xf32>
    %569 = vector.extract_strided_slice %551 {offsets = [0, 64], sizes = [2, 256], strides = [1, 1]} : vector<2x352xf32> to vector<2x256xf32>
    %570 = arith.addf %568, %569 : vector<2x256xf32>
    %571 = vector.extract_strided_slice %555 {offsets = [0, 80], sizes = [2, 256], strides = [1, 1]} : vector<2x352xf32> to vector<2x256xf32>
    %572 = arith.addf %570, %571 : vector<2x256xf32>
    %573 = vector.extract_strided_slice %559 {offsets = [0, 96], sizes = [2, 256], strides = [1, 1]} : vector<2x352xf32> to vector<2x256xf32>
    %574 = arith.addf %572, %573 : vector<2x256xf32>
    %c0_97 = arith.constant 0 : index
    %575 = memref.load %arg2[%c0_97] : memref<1xf32, #tpu.memory_space<smem>>
    %576 = vector.broadcast %575 : f32 to vector<2x256xf32>
    %577 = arith.addf %574, %576 : vector<2x256xf32>
    %578 = arith.negf %577 : vector<2x256xf32>
    %579 = math.exp %578 : vector<2x256xf32>
    %cst_98 = arith.constant 1.000000e+00 : f32
    %580 = vector.broadcast %cst_98 : f32 to vector<2x256xf32>
    %581 = arith.addf %580, %579 : vector<2x256xf32>
    %582 = arith.divf %580, %581 : vector<2x256xf32>
    %c0_99 = arith.constant 0 : index
    %c0_100 = arith.constant 0 : index
    %583 = vector.load %arg6[%c0_99, %c0_100] : memref<2x256xf32, #tpu.memory_space<vmem>>, vector<2x256xf32>
    tpu.vector_store %arg6[%c0_99, %c0_100], %582 {strides = array<i32>} : memref<2x256xf32, #tpu.memory_space<vmem>>, vector<2x256xf32>,
    %c0_101 = arith.constant 0 : index
    %c0_102 = arith.constant 0 : index
    %584 = vector.load %arg6[%c0_101, %c0_102] : memref<2x256xf32, #tpu.memory_space<vmem>>, vector<1x256xf32>
    %c0_103 = arith.constant 0 : index
    %c0_104 = arith.constant 0 : index
    %c0_105 = arith.constant 0 : index
    %585 = vector.load %arg3[%c0_103, %c0_104, %c0_105] : memref<2x4x256xf32, #tpu.memory_space<vmem>>, vector<1x4x256xf32>
    %586 = vector.shape_cast %585 : vector<1x4x256xf32> to vector<4x256xf32>
    %587 = vector.broadcast %584 : vector<1x256xf32> to vector<4x256xf32>
    %588 = arith.mulf %586, %587 : vector<4x256xf32>
    %c0_106 = arith.constant 0 : index
    %c0_107 = arith.constant 0 : index
    %c0_108 = arith.constant 0 : index
    %589 = vector.load %arg4[%c0_106, %c0_107, %c0_108] : memref<2x4x256xf32, #tpu.memory_space<vmem>>, vector<1x4x256xf32>
    %590 = vector.shape_cast %589 : vector<1x4x256xf32> to vector<4x256xf32>
    %591 = vector.shape_cast %588 : vector<4x256xf32> to vector<1x4x256xf32>
    tpu.vector_store %arg4[%c0_106, %c0_107, %c0_108], %591 {strides = array<i32>} : memref<2x4x256xf32, #tpu.memory_space<vmem>>, vector<1x4x256xf32>,
    %c1_109 = arith.constant 1 : index
    %c0_110 = arith.constant 0 : index
    %592 = vector.load %arg6[%c1_109, %c0_110] : memref<2x256xf32, #tpu.memory_space<vmem>>, vector<1x256xf32>
    %c1_111 = arith.constant 1 : index
    %c0_112 = arith.constant 0 : index
    %c0_113 = arith.constant 0 : index
    %593 = vector.load %arg3[%c1_111, %c0_112, %c0_113] : memref<2x4x256xf32, #tpu.memory_space<vmem>>, vector<1x4x256xf32>
    %594 = vector.shape_cast %593 : vector<1x4x256xf32> to vector<4x256xf32>
    %595 = vector.broadcast %592 : vector<1x256xf32> to vector<4x256xf32>
    %596 = arith.mulf %594, %595 : vector<4x256xf32>
    %c1_114 = arith.constant 1 : index
    %c0_115 = arith.constant 0 : index
    %c0_116 = arith.constant 0 : index
    %597 = vector.load %arg4[%c1_114, %c0_115, %c0_116] : memref<2x4x256xf32, #tpu.memory_space<vmem>>, vector<1x4x256xf32>
    %598 = vector.shape_cast %597 : vector<1x4x256xf32> to vector<4x256xf32>
    %599 = vector.shape_cast %596 : vector<4x256xf32> to vector<1x4x256xf32>
    tpu.vector_store %arg4[%c1_114, %c0_115, %c0_116], %599 {strides = array<i32>} : memref<2x4x256xf32, #tpu.memory_space<vmem>>, vector<1x4x256xf32>,
    return
  }
  func.func @transform_0(%arg0: i32) -> i32 {
    %c0_i32 = arith.constant 0 : i32
    %c0_i32_0 = arith.constant 0 : i32
    return %c0_i32 : i32
  }
  func.func @transform_1(%arg0: i32) -> i32 {
    %c0_i32 = arith.constant 0 : i32
    %c0_i32_0 = arith.constant 0 : i32
    return %c0_i32 : i32
  }
  func.func @transform_2(%arg0: i32) -> (i32, i32, i32) {
    %c0_i32 = arith.constant 0 : i32
    %c0_i32_0 = arith.constant 0 : i32
    %c0_i32_1 = arith.constant 0 : i32
    return %arg0, %c0_i32, %c0_i32_0 : i32, i32, i32
  }
  func.func @transform_3(%arg0: i32) -> (i32, i32, i32) {
    %c0_i32 = arith.constant 0 : i32
    %c0_i32_0 = arith.constant 0 : i32
    %c0_i32_1 = arith.constant 0 : i32
    return %arg0, %c0_i32, %c0_i32_0 : i32, i32, i32
  }
}

</mosaic_0001>

<bundles_post_ra>
// kernel: tpu_custom_call.1
= control target key start
LH: loop header
LB: loop body
LE: loop exit
PB: predicated region body
PF: predicated region fallthrough
CT: control target
= control target key end

     0   :  { %9 = vsyncpa [#allocation8], 0  ;;  %s2342_s0 = inlined_call_operand.vmem [shape: f32[98], index: 0, kind: input, shape index: {}]   ;;  %s2343_s1 = inlined_call_operand.<no memory space> [shape: f32[1], index: 1, kind: input, shape index: {}]   ;;  %s2344_s2 = inlined_call_operand.hbm [shape: f32[2,4,256], index: 2, kind: input, shape index: {}]   ;;  %s2345_s3 = inlined_call_operand.hbm [shape: f32[2,4,256], index: 3, kind: output, shape index: {}]  }
   0x1   :  { %10 = vsyncpa [#allocation6], 0 }
   0x2   :  { %11 = vsyncpa [#allocation7], 0  ;;  %s17_s14 = sshll.u32 %s2342_s0, 4  ;;  %s27_s17 = sshll.u32 %s2344_s2, 4  ;;  %s18_s14 = int_to_ptr.vmem [resolvable:$true] %s17_s14  ;;  %s28_s17 = int_to_ptr.hbm [resolvable:$true] %s27_s17 }
   0x3   :  { %s1645_s18 = smov [#allocation5]   ;;  %s1646_s19 = smov [#allocation9]  }
   0x4   :  { %20 = dma.vmem_to_smem %s18_s14, 16, %s1645_s18, [#allocation8]  }
   0x5   :  { %s29_s20 = sshll.u32 %s1646_s19, 4  ;;  %s1647_s21 = smov 128   ;;  %s30_s20 = int_to_ptr.vmem [resolvable:$true] %s29_s20 }
   0x6   :  { %s1648_s22 = smov 8  }
   0x7   :  { %35 = dma.hbm_to_vmem [thread:$0]  %s28_s17, 256, %s30_s20, [#allocation6], %s1647_s21, %s1647_s21, %s1648_s22  }
   0x8   :  { %1639 = dma.done.wait [#allocation8], 16  }
   0x9   :  { %1640 = vsyncadd [#allocation8], 4294967280 }
   0xa   :  { %1641 = dma.done.wait [#allocation6], 256  }
   0xb   :  { %1642 = vsyncadd [#allocation6], 4294967040 }
   0xc   :  { %44 = sfence }
   0xd   :  { %v104_v0 = vlaneseq  ;;  %v52_v1 = vld [vmem:[#allocation9] sm:$0xff]  ;;  %vm45_vm0 = vcmask 1041408   ;;  %vm59_vm1 = vcmask 1043456   ;;  %v1649_v15 = vmov 0.0   ;;  %s1650_s0 = smov 2   ;;  %s1651_s2 = smov 5  }
   0xe   :  { %54 = vst [vmem:[#allocation1] ss:$2 sm:$0xff] %v52_v1  ;;  %v121_v57 = vld [vmem:[#allocation9 + $0x8] sm:$0xff]  ;;  %s1652_s23 = smov 4   ;;  %vm96_vm14 = vcmask 1040384   ;;  %s1653_s24 = smov 51  }
   0xf   :  { %v184_v2 = vand.u32 127, %v104_v0  ;;  %s1654_s25 = smov 1   ;;  %s1655_s26 = smov 6  }
  0x10   :  { %s1475_s27 = sld [smem:[#allocation5 + $0x11]]  ;;  %s1656_s6 = smov 125  }
  0x11   :  { %v185_v3 = vadd.s32 128, %v184_v2  ;;  %v186_v4 = vadd.s32 256, %v184_v2  ;;  %v1699_v5 = vand.u32 15, %v184_v2  ;;  %s1474_s28 = sld [smem:[#allocation5 + $0xa]]  ;;  %s1657_s13 = smov 127  }
  0x12   :  { %s1473_s29 = sld [smem:[#allocation5 + $0x3]]  ;;  %s1658_s20 = smov 126  }
  0x13   :  { %v1701_v6 = vand.u32 15, %v185_v3  ;;  %v1703_v7 = vand.u32 15, %v186_v4  ;;  %v223_v8 = vadd.s32 4294967293, %v1699_v5  ;;  %v259_v9 = vadd.s32 4294967295, %v1699_v5  ;;  %s1478_s30 = sld [smem:[#allocation5 + $0x26]] }
  0x14   :  { %v295_v10 = vadd.s32 2, %v1699_v5  ;;  %v277_v11 = vadd.s32 1, %v1699_v5  ;;  %v241_v4 = vadd.s32 4294967294, %v1699_v5  ;;  %s1477_s4 = sld [smem:[#allocation5 + $0x1f]] }
  0x15   :  { %v224_v12 = vadd.s32 4294967293, %v1701_v6  ;;  %v225_v13 = vadd.s32 4294967293, %v1703_v7  ;;  %vm226_vm2 = vcmp.ge.s32.totalorder %v223_v8, 0  ;;  %v260_v14 = vadd.s32 4294967295, %v1701_v6  ;;  %s1476_s5 = sld [smem:[#allocation5 + $0x18]] }
  0x16   :  { %v1435_v16 = vsel %vm226_vm2, 1.0, %v1649_v15  ;;  %v261_v17 = vadd.s32 4294967295, %v1703_v7  ;;  %vm262_vm3 = vcmp.ge.s32.totalorder %v259_v9, 0  ;;  %v296_v18 = vadd.s32 2, %v1701_v6  ;;  %s1461_s7 = sld [smem:[#allocation5 + $0xf]] }
  0x17   :  { %vm227_vm4 = vcmp.ge.s32.totalorder %v224_v12, 0  ;;  %vm228_vm5 = vcmp.ge.s32.totalorder %v225_v13, 0  ;;  %vm263_vm6 = vcmp.ge.s32.totalorder %v260_v14, 0  ;;  %v1441_v19 = vsel %vm262_vm3, 1.0, %v1649_v15  ;;  %s1460_s8 = sld [smem:[#allocation5 + $0x8]] }
  0x18   :  { %v1436_v20 = vsel %vm227_vm4, 1.0, %v1649_v15  ;;  %v1437_v21 = vsel %vm228_vm5, 1.0, %v1649_v15  ;;  %vm264_vm7 = vcmp.ge.s32.totalorder %v261_v17, 0  ;;  %v1442_v22 = vsel %vm263_vm6, 1.0, %v1649_v15  ;;  %s1479_s9 = sld [smem:[#allocation5 + $0x2d]] }
  0x19   :  { %v1443_v23 = vsel %vm264_vm7, 1.0, %v1649_v15  ;;  %v335_v24 = vrot.slane %v1436_v20, 6  ;;  %v336_v25 = vrot.slane %v1437_v21, 4  ;;  %v457_v26 = vrot.slane %v1442_v22, 6  ;;  %s1464_s10 = sld [smem:[#allocation5 + $0x24]] }
  0x1a   :  { %v458_v27 = vrot.slane %v1443_v23, 4  ;;  %v297_v28 = vadd.s32 2, %v1703_v7  ;;  %vm301_vm8 = vcmp.lt.s32.totalorder %v295_v10, 16  ;;  %vm302_vm9 = vcmp.lt.s32.totalorder %v296_v18, 16  ;;  %s1463_s11 = sld [smem:[#allocation5 + $0x1d]] }
  0x1b   :  { %v459_v29 = vsel %vm45_vm0, %v1441_v19, %v457_v26  ;;  %v337_v30 = vsel %vm45_vm0, %v1435_v16, %v335_v24  ;;  %v1447_v31 = vsel %vm301_vm8, 1.0, %v1649_v15  ;;  %v1448_v32 = vsel %vm302_vm9, 1.0, %v1649_v15  ;;  %v55_v33 = vld.sshfl [vmem:[#allocation1] sm:$0xff pattern:$0x75316420]  ;;  %s1459_s12 = sld [smem:[#allocation5 + $0x1]] }
  0x1c   :  { %v460_v34 = vsel %vm59_vm1, %v459_v29, %v458_v27  ;;  %v1727_v35 = vsel %vm59_vm1, %v337_v30, %v336_v25  ;;  %vm303_vm10 = vcmp.lt.s32.totalorder %v297_v28, 16  ;;  %v698_v36 = vrot.slane %v1448_v32, 6  ;;  %v56_v37 = vld.sshfl [vmem:[#allocation1 + $0x8] sm:$0xff pattern:$0x75316420]  ;;  %s1466_s14 = sld [smem:[#allocation5 + $0x2]] }
  0x1d   :  { %461 = vrot.lane.b32.xlu0 %v460_v34, %s1650_s0  ;;  %v1449_v38 = vsel %vm303_vm10, 1.0, %v1649_v15  ;;  %v278_v39 = vadd.s32 1, %v1701_v6  ;;  %v279_v40 = vadd.s32 1, %v1703_v7  ;;  %vm283_vm11 = vcmp.lt.s32.totalorder %v277_v11, 16  ;;  %74 = vst [vmem:[#allocation1] ss:$2 sm:$0xff] %v52_v1 }
  0x1e   :  { %v699_v41 = vrot.slane %v1449_v38, 4  ;;  %v700_v42 = vsel %vm45_vm0, %v1447_v31, %v698_v36  ;;  %v1444_v43 = vsel %vm283_vm11, 1.0, %v1649_v15  ;;  %v60_v44 = vsel %vm59_vm1, %v55_v33, -inf  ;;  %s1468_s15 = sld [smem:[#allocation5 + $0x10]] }
  0x1f   :  { %vm284_vm12 = vcmp.lt.s32.totalorder %v278_v39, 16  ;;  %vm285_vm13 = vcmp.lt.s32.totalorder %v279_v40, 16  ;;  %v61_v45 = vrot.slane %v60_v44, 4  ;;  %v67_v46 = vsel %vm59_vm1, %v56_v37, -inf  ;;  %s1462_s16 = sld [smem:[#allocation5 + $0x16]] }
  0x20   :  { %v701_v47 = vsel %vm59_vm1, %v700_v42, %v699_v41  ;;  %v1445_v48 = vsel %vm284_vm12, 1.0, %v1649_v15  ;;  %v1446_v49 = vsel %vm285_vm13, 1.0, %v1649_v15  ;;  %v68_v50 = vrot.slane %v67_v46, 4  ;;  %s1469_s17 = sld [smem:[#allocation5 + $0x17]] }
  0x21   :  { %702 = vrot.lane.b32.xlu1 %v701_v47, %s1651_s2  ;;  %v613_v51 = vrot.slane %v1445_v48, 6  ;;  %v614_v52 = vrot.slane %v1446_v49, 4  ;;  %v62_v53 = vmax.f32 %v60_v44, %v61_v45  ;;  %v242_v10 = vadd.s32 4294967294, %v1701_v6  ;;  %s1471_s18 = sld [smem:[#allocation5 + $0x25]] }
  0x22   :  { %v69_v54 = vmax.f32 %v67_v46, %v68_v50  ;;  %v243_v11 = vadd.s32 4294967294, %v1703_v7  ;;  %vm244_vm15 = vcmp.ge.s32.totalorder %v241_v4, 0  ;;  %v313_v14 = vadd.s32 3, %v1699_v5  ;;  %s1465_s19 = sld [smem:[#allocation5 + $0x2b]] }
  0x23   :  { %v615_v55 = vsel %vm45_vm0, %v1444_v43, %v613_v51  ;;  %v63_v56 = vrot.slane %v62_v53, 2  ;;  %vm245_vm2 = vcmp.ge.s32.totalorder %v242_v10, 0  ;;  %v1438_v20 = vsel %vm244_vm15, 1.0, %v1649_v15  ;;  %s1472_s0 = sld [smem:[#allocation5 + $0x2c]] }
  0x24   :  { %v616_v58 = vsel %vm59_vm1, %v615_v55, %v614_v52  ;;  %v70_v59 = vrot.slane %v69_v54, 2  ;;  %v75_v60 = vld.sshfl [vmem:[#allocation1] sm:$0xff pattern:$0x75316420]  ;;  %vm246_vm3 = vcmp.ge.s32.totalorder %v243_v11, 0  ;;  %v1439_v21 = vsel %vm245_vm2, 1.0, %v1649_v15 }
  0x25   :  { %617 = vrot.lane.b32.xlu0 %v616_v58, %s1652_s23  ;;  %v64_v61 = vmax.f32 %v62_v53, %v63_v56  ;;  %v76_v62 = vld.sshfl [vmem:[#allocation1 + $0x8] sm:$0xff pattern:$0x75316420]  ;;  %v79_v63 = vsel %vm59_vm1, %v75_v60, 0.0  ;;  %v1440_v23 = vsel %vm246_vm3, 1.0, %v1649_v15  ;;  %v372_v24 = vrot.slane %v1439_v21, 6 }
  0x26   :  { %v71_v1 = vmax.f32 %v69_v54, %v70_v59  ;;  %123 = vst [vmem:[#allocation1] ss:$2 sm:$0xff] %v121_v57  ;;  %v80_v2 = vrot.slane %v79_v63, 4  ;;  %v86_v3 = vsel %vm59_vm1, %v76_v62, 0.0  ;;  %v314_v25 = vadd.s32 3, %v1701_v6  ;;  %s1482_s2 = sld [smem:[#allocation5 + $0x12]] }
  0x27   :  { %v65_v8 = vrot.slane %v64_v61, 1  ;;  %v87_v9 = vrot.slane %v86_v3, 4  ;;  %v373_v28 = vrot.slane %v1440_v23, 4  ;;  %v315_v5 = vadd.s32 3, %v1703_v7  ;;  %s1467_s23 = sld [smem:[#allocation5 + $0x9]] }
  0x28   :  { %v72_v12 = vrot.slane %v71_v1, 1  ;;  %v81_v13 = vadd.f32 %v80_v2, %v79_v63  ;;  %v374_v32 = vsel %vm45_vm0, %v1438_v20, %v372_v24  ;;  %vm319_vm4 = vcmp.lt.s32.totalorder %v313_v14, 16 }
  0x29   :  { %v66_v16 = vmax.f32 %v64_v61, %v65_v8  ;;  %v88_v17 = vadd.f32 %v87_v9, %v86_v3  ;;  %v375_v7 = vsel %vm59_vm1, %v374_v32, %v373_v28  ;;  %vm320_vm5 = vcmp.lt.s32.totalorder %v314_v25, 16 }
  0x2a   :  { %v73_v18 = vmax.f32 %v71_v1, %v72_v12  ;;  %v82_v19 = vrot.slane %v81_v13, 2  ;;  %376 = vrot.lane.b32.xlu2 %v375_v7, %s1654_s25  ;;  %vm321_vm6 = vcmp.lt.s32.totalorder %v315_v5, 16  ;;  %v1450_v44 = vsel %vm319_vm4, 1.0, %v1649_v15  ;;  %s1483_s25 = sld [smem:[#allocation5 + $0x19]] }
  0x2b   :  { %v89_v22 = vrot.slane %v88_v17, 2  ;;  %v1451_v45 = vsel %vm320_vm5, 1.0, %v1649_v15  ;;  %v1452_v46 = vsel %vm321_vm6, 1.0, %v1649_v15  ;;  %vm46_vm7 = vcmask 1043458  }
  0x2c   :  { %v95_v26 = vrot.slane %v73_v18, 7  ;;  %v83_v27 = vadd.f32 %v82_v19, %v81_v13  ;;  %v783_v50 = vrot.slane %v1451_v45, 6  ;;  %v784_v51 = vrot.slane %v1452_v46, 4  ;;  %vm47_vm9 = vmor %vm46_vm7, %vm45_vm0 }
  0x2d   :  { %v124_v29 = vld.sshfl [vmem:[#allocation1] sm:$0xff pattern:$0x75316420]  ;;  %v125_v30 = vld.sshfl [vmem:[#allocation1 + $0x8] sm:$0xff pattern:$0x75316420]  ;;  %v90_v31 = vadd.f32 %v89_v22, %v88_v17  ;;  %v591_v46 = vstv %s1478_s30 }
  0x2e   :  { %v97_v33 = vsel %vm96_vm14, %v66_v16, %v95_v26  ;;  %v128_v34 = vsel %vm59_vm1, %v124_v29, -inf  ;;  %v135_v36 = vsel %vm59_vm1, %v125_v30, -inf  ;;  %142 = vst [vmem:[#allocation1] ss:$2 sm:$0xff] %v121_v57  ;;  %v84_v37 = vrot.slane %v83_v27, 1  ;;  %s1481_s30 = sld [smem:[#allocation5 + $0xb]] }
  0x2f   :  { %98 = vrot.lane.b32.xlu0 %v97_v33, %s1653_s24  ;;  %v129_v6 = vrot.slane %v128_v34, 4  ;;  %v136_v38 = vrot.slane %v135_v36, 4  ;;  %v91_v39 = vrot.slane %v90_v31, 1  ;;  %v785_v57 = vsel %vm45_vm0, %v1450_v44, %v783_v50 }
  0x30   :  { %v85_v42 = vadd.f32 %v84_v37, %v83_v27  ;;  %v786_v60 = vsel %vm59_vm1, %v785_v57, %v784_v51  ;;  %vm48_vm8 = vcmask 832516   ;;  %vm105_vm11 = vcmp.ge.s32.totalorder %v104_v0, 51 }
  0x31   :  { %v130_v40 = vmax.f32 %v128_v34, %v129_v6  ;;  %v137_v41 = vmax.f32 %v135_v36, %v136_v38  ;;  %v92_v43 = vadd.f32 %v91_v39, %v90_v31  ;;  %vm49_vm10 = vmor %vm48_vm8, %vm47_vm9  ;;  %vm106_vm12 = vcmp.lt.s32.totalorder %v104_v0, 307 }
  0x32   :  { %787 = vrot.lane.b32.xlu2 %v786_v60, %s1655_s26  ;;  %50 = vst.msk [vmem:[#allocation2] sm:$0x3f] %vm49_vm10, %v1649_v15  ;;  %vm101_vm13 = vcmask 416768   ;;  %v561_v34 = vstv %s1475_s27  ;;  %v551_v36 = vstv %s1474_s28  ;;  %v540_v37 = vstv %s1473_s29  ;;  %s1470_s26 = sld [smem:[#allocation5 + $0x1e]]  ;;  %s1659_s27 = smov 124  }
  0x33   :  { %v131_v47 = vrot.slane %v130_v40, 2  ;;  %v138_v48 = vrot.slane %v137_v41, 2  ;;  %v111_v49 = vrot.slane %v92_v43, 7  ;;  %51 = vst.msk [vmem:[#allocation2 + $0x6] sm:$0x3f] %vm49_vm10, %v1649_v15  ;;  %vm705_vm0 = vcmask 39936  }
  0x34   :  { %vm379_vm15 = vcmask 7168   ;;  %v601_v57 = vstv %s1479_s9  ;;  %vm464_vm2 = vcmask 15360   ;;  %vm620_vm3 = vcmask 31744   ;;  %s1484_s28 = sld [smem:[#allocation5 + $0x20]] }
  0x35   :  { %v132_v52 = vmax.f32 %v130_v40, %v131_v47  ;;  %v139_v53 = vmax.f32 %v137_v41, %v138_v48  ;;  %v143_v54 = vld.sshfl [vmem:[#allocation1] sm:$0xff pattern:$0x75316420]  ;;  %v144_v55 = vld.sshfl [vmem:[#allocation1 + $0x8] sm:$0xff pattern:$0x75316420]  ;;  %v112_v56 = vsel %vm96_vm14, %v85_v42, %v111_v49  ;;  %v581_v47 = vstv %s1477_s4 }
  0x36   :  { %v147_v58 = vsel %vm59_vm1, %v143_v54, 0.0  ;;  %v154_v59 = vsel %vm59_vm1, %v144_v55, 0.0  ;;  %v571_v48 = vstv %s1476_s5  ;;  %v405_v54 = vstv %s1461_s7  ;;  %s1486_s29 = sld [smem:[#allocation5 + $0x2e]] }
  0x37   :  { %v133_v61 = vrot.slane %v132_v52, 1  ;;  %v140_v62 = vrot.slane %v139_v53, 1  ;;  %v148_v63 = vrot.slane %v147_v58, 4  ;;  %v155_v1 = vrot.slane %v154_v59, 4  ;;  %113 = vrot.lane.b32.xlu0 %v112_v56, %s1653_s24  ;;  %s1487_s4 = sld [smem:[#allocation5 + $0x5]] }
  0x38   :  { %v395_v55 = vstv %s1460_s8  ;;  %s1489_s5 = sld [smem:[#allocation5 + $0x13]]  ;;  %vm790_vm4 = vcmask 48128   ;;  %vm390_vm5 = vcmask 1039360   ;;  %vm475_vm6 = vcmask 1031168  }
  0x39   :  { %v134_v2 = vmax.f32 %v132_v52, %v133_v61  ;;  %v141_v3 = vmax.f32 %v139_v53, %v140_v62  ;;  %v149_v4 = vadd.f32 %v148_v63, %v147_v58  ;;  %v156_v8 = vadd.f32 %v155_v1, %v154_v59  ;;  %s1485_s7 = sld [smem:[#allocation5 + $0x27]] }
  0x3a   :  { %v435_v61 = vstv %s1464_s10  ;;  %v425_v62 = vstv %s1463_s11  ;;  %v384_v63 = vstv %s1459_s12  ;;  %s1490_s8 = sld [smem:[#allocation5 + $0x1a]]  ;;  %s1660_s11 = smov 123   ;;  %vm546_vm7 = vcmask 1022976  }
  0x3b   :  { %v163_v9 = vrot.slane %v141_v3, 7  ;;  %v150_v10 = vrot.slane %v149_v4, 2  ;;  %v157_v11 = vrot.slane %v156_v8, 2  ;;  %s1492_s9 = sld [smem:[#allocation5 + $0x28]]  ;;  %vm631_vm8 = vcmask 1014784  }
  0x3c   :  { %s1488_s10 = sld [smem:[#allocation5 + $0xc]]  ;;  %vm716_vm9 = vcmask 1006592   ;;  %vm801_vm10 = vcmask 998400  }
  0x3d   :  { %v164_v12 = vsel %vm96_vm14, %v134_v2, %v163_v9  ;;  %v151_v13 = vadd.f32 %v150_v10, %v149_v4  ;;  %v158_v14 = vadd.f32 %v157_v11, %v156_v8  ;;  %v469_v10 = vstv %s1466_s14  ;;  %s1493_s12 = sld [smem:[#allocation5 + $0x2f]] }
  0x3e   :  { %165 = vrot.lane.b32.xlu1 %v164_v12, %s1653_s24  ;;  %v490_v11 = vstv %s1468_s15  ;;  %v415_v12 = vstv %s1462_s16  ;;  %s1495_s14 = sld [smem:[#allocation5 + $0xd]] }
  0x3f   :  { %v152_v16 = vrot.slane %v151_v13, 1  ;;  %v159_v17 = vrot.slane %v158_v14, 1  ;;  %s1491_s15 = sld [smem:[#allocation5 + $0x21]] }
  0x40   :  { %s1525_s16 = sld [smem:[#allocation5 + $0x49]] }
  0x41   :  { %v153_v18 = vadd.f32 %v152_v16, %v151_v13  ;;  %v160_v19 = vadd.f32 %v159_v17, %v158_v14  ;;  %v500_v17 = vstv %s1469_s17  ;;  %s1496_s17 = sld [smem:[#allocation5 + $0x14]] }
  0x43   :  { %v174_v20 = vrot.slane %v160_v19, 7  ;;  %v445_v19 = vstv %s1465_s19  ;;  %s1661_s19 = smov 122  }
  0x45   :  { %v175_v21 = vsel %vm96_vm14, %v153_v18, %v174_v20  ;;  %vm1780_vm14 = vmand %vm105_vm11, %vm106_vm12  ;;  %v520_v18 = vstv %s1471_s18  ;;  %s1494_s18 = sld [smem:[#allocation5 + $0x6]]  ;;  %vm1325_vm11 = vcmask 916480   ;;  %vm1333_vm12 = vcmask 785408  }
  0x46   :  { %176 = vrot.lane.b32.xlu1 %v175_v21, %s1653_s24  ;;  %s1480_s24 = sld [smem:[#allocation5 + $0x4]] }
  0x84   :  { %v377_v43 = vpop.permute.xlu2 %376 }
  0x85   :  { %v378_v45 = vrot.slane %v377_v43, 6 }
  0x87   :  { %v1812_v51 = vsel %vm379_vm15, %v378_v45, %v377_v43  ;;  %v731_v43 = vstv %s1489_s5  ;;  %v676_v45 = vstv %s1485_s7  ;;  %s1906_s5 = sld [smem:[#allocation5 + $0x15]]  ;;  %vm1365_vm15 = vcmask 261120  }
  0x88   :  { %s1912_s7 = sld [smem:[#allocation5 + $0x48]] }
  0x8f   :  { %v1774_v22 = vpop.permute.xlu0 %461 }
  0x90   :  { %v463_v1 = vrot.slane %v1774_v22, 6 }
  0x92   :  { %v1832_v8 = vsel %vm464_vm2, %v463_v1, %v1774_v22 }
  0x93   :  { %v703_v15 = vpop.permute.xlu1 %702 }
  0x94   :  { %v704_v6 = vrot.slane %v703_v15, 6 }
  0x96   :  { %v1803_v42 = vsel %vm705_vm0, %v704_v6, %v703_v15  ;;  %v646_v15 = vstv %s1482_s2  ;;  %v636_v6 = vstv %s1481_s30  ;;  %s1509_s2 = sld [smem:[#allocation5 + $0x39]]  ;;  %vm1357_vm0 = vcmask 392192  }
  0x97   :  { %v1776_v23 = vpop.permute.xlu0 %617  ;;  %s1523_s30 = sld [smem:[#allocation5 + $0x3b]] }
  0x98   :  { %v619_v20 = vrot.slane %v1776_v23, 6 }
  0x9a   :  { %v1844_v25 = vsel %vm620_vm3, %v619_v20, %v1776_v23  ;;  %v625_v23 = vstv %s1480_s24  ;;  %s1499_s24 = sld [smem:[#allocation5 + $0x29]] }
  0xa1   :  { %v99_v24 = vpop.permute.xlu0 %98 }
  0xa2   :  { %v100_v26 = vrot.slane %v99_v24, 7 }
  0xa4   :  { %v102_v27 = vsel %vm101_vm13, %v100_v26, %v99_v24 }
  0xa5   :  { %108 = vst.msk [vmem:[#allocation2] ss:$2 sm:$0x7] %vm1780_vm14, %v102_v27  ;;  %v530_v27 = vstv %s1472_s0  ;;  %s1498_s0 = sld [smem:[#allocation5 + $0x22]] }
  0xa9   :  { %v114_v28 = vpop.permute.xlu0 %113 }
  0xaa   :  { %v115_v5 = vrot.slane %v114_v28, 7 }
  0xac   :  { %v116_v29 = vsel %vm101_vm13, %v115_v5, %v114_v28  ;;  %v480_v28 = vstv %s1467_s23  ;;  %s1497_s23 = sld [smem:[#allocation5 + $0x1b]] }
  0xad   :  { %119 = vst.msk [vmem:[#allocation2 + $0x6] ss:$2 sm:$0x7] %vm1780_vm14, %v116_v29 }
  0xb0   :  { %v166_v0 = vpop.permute.xlu1 %165 }
  0xb1   :  { %v167_v30 = vrot.slane %v166_v0, 7 }
  0xb3   :  { %v168_v31 = vsel %vm101_vm13, %v167_v30, %v166_v0  ;;  %v656_v30 = vstv %s1483_s25  ;;  %s1516_s25 = sld [smem:[#allocation5 + $0x3a]] }
  0xb4   :  { %171 = vst.msk [vmem:[#allocation2 + $0x1] ss:$2 sm:$0x7] %vm1780_vm14, %v168_v31  ;;  %v510_v31 = vstv %s1470_s26  ;;  %s1500_s26 = sld [smem:[#allocation5 + $0x30]] }
  0xb8   :  { %v177_v32 = vpop.permute.xlu1 %176 }
  0xb9   :  { %v178_v33 = vrot.slane %v177_v32, 7 }
  0xbb   :  { %v1793_v38 = vld [vmem:[#allocation2] sm:$0x3f]  ;;  %v179_v39 = vsel %vm101_vm13, %v178_v33, %v177_v32  ;;  %vm1341_vm13 = vcmask 654336  }
  0xbc   :  { %182 = vst.msk [vmem:[#allocation2 + $0x7] ss:$2 sm:$0x7] %vm1780_vm14, %v179_v39  ;;  %v562_v7 = vmul.f32 %v561_v34, %v1793_v38  ;;  %v552_v40 = vmul.f32 %v551_v36, %v1793_v38  ;;  %v541_v41 = vmul.f32 %v540_v37, %v1793_v38  ;;  %v1808_v44 = vmul.f32 %v1803_v42, %v1793_v38 }
  0xbd   :  { %v592_v49 = vmul.f32 %v591_v46, %v1793_v38  ;;  %v582_v50 = vmul.f32 %v581_v47, %v1793_v38  ;;  %v572_v52 = vmul.f32 %v571_v48, %v1793_v38  ;;  %v382_v53 = vmul.f32 %v1812_v51, %v1793_v38 }
  0xbe   :  { %564 = vrot.lane.b32.xlu1 %v562_v7, %s1656_s6  ;;  %554 = vrot.lane.b32.xlu0 %v552_v40, %s1656_s6  ;;  %v1822_v56 = vmul.f32 %v1727_v35, %v1793_v38  ;;  %v602_v60 = vmul.f32 %v601_v57, %v1793_v38  ;;  %v467_v9 = vmul.f32 %v1832_v8, %v1793_v38  ;;  %v666_v36 = vstv %s1484_s28  ;;  %s341_s28 = sld [smem:[#allocation5]] }
  0xbf   :  { %543 = vrot.lane.b32.xlu2 %v541_v41, %s1656_s6  ;;  %v406_v58 = vmul.f32 %v405_v54, %v382_v53  ;;  %v396_v59 = vmul.f32 %v395_v55, %v382_v53  ;;  %v436_v2 = vmul.f32 %v435_v61, %v382_v53  ;;  %v426_v3 = vmul.f32 %v425_v62, %v382_v53 }
  0xc0   :  { %v385_v4 = vmul.f32 %v384_v63, %v382_v53  ;;  %v470_v13 = vmul.f32 %v469_v10, %v467_v9  ;;  %v491_v14 = vmul.f32 %v490_v11, %v467_v9  ;;  %v416_v16 = vmul.f32 %v415_v12, %v382_v53 }
  0xc1   :  { %v501_v21 = vmul.f32 %v500_v17, %v467_v9  ;;  %v521_v22 = vmul.f32 %v520_v18, %v467_v9  ;;  %v446_v24 = vmul.f32 %v445_v19, %v382_v53  ;;  %v623_v26 = vmul.f32 %v1844_v25, %v1793_v38 }
  0xc2   :  { %v531_v5 = vmul.f32 %v530_v27, %v467_v9  ;;  %v481_v0 = vmul.f32 %v480_v28, %v467_v9  ;;  %v511_v34 = vmul.f32 %v510_v31, %v467_v9  ;;  %v686_v37 = vstv %s1486_s29  ;;  %s1517_s29 = sld [smem:[#allocation5 + $0x41]] }
  0xc3   :  { %v647_v29 = vmul.f32 %v646_v15, %v623_v26  ;;  %v626_v32 = vmul.f32 %v625_v23, %v623_v26  ;;  %v657_v33 = vmul.f32 %v656_v30, %v623_v26  ;;  %v667_v39 = vmul.f32 %v666_v36, %v623_v26 }
  0xc4   :  { %v687_v7 = vmul.f32 %v686_v37, %v623_v26  ;;  %v637_v40 = vmul.f32 %v636_v6, %v623_v26  ;;  %v710_v41 = vstv %s1487_s4  ;;  %v732_v47 = vmul.f32 %v731_v43, %v1808_v44  ;;  %s1524_s4 = sld [smem:[#allocation5 + $0x42]] }
  0xc5   :  { %v711_v46 = vmul.f32 %v710_v41, %v1808_v44  ;;  %v677_v48 = vmul.f32 %v676_v45, %v623_v26  ;;  %v761_v53 = vstv %s1492_s9  ;;  %v721_v54 = vstv %s1488_s10  ;;  %s1526_s9 = sld [smem:[#allocation5 + $0x50]] }
  0xc6   :  { %594 = vrot.lane.b32.xlu1 %v592_v49, %s1656_s6  ;;  %584 = vrot.lane.b32.xlu0 %v582_v50, %s1656_s6  ;;  %v788_v49 = vpop.permute.xlu2 %787  ;;  %v762_v57 = vmul.f32 %v761_v53, %v1808_v44  ;;  %v771_v61 = vstv %s1493_s12  ;;  %v806_v62 = vstv %s1495_s14  ;;  %s1921_s10 = sld [smem:[#allocation5 + $0xe]]  ;;  %vm1349_vm14 = vcmask 523264  }
  0xc7   :  { %574 = vrot.lane.b32.xlu2 %v572_v52, %s1656_s6  ;;  %v789_v50 = vrot.slane %v788_v49, 6  ;;  %v741_v52 = vstv %s1490_s8  ;;  %v751_v63 = vstv %s1491_s15  ;;  %v772_v1 = vmul.f32 %v771_v61, %v1808_v44  ;;  %s1512_s8 = sld [smem:[#allocation5 + $0x4e]] }
  0xc8   :  { %v742_v55 = vmul.f32 %v741_v52, %v1808_v44  ;;  %v816_v10 = vstv %s1496_s17  ;;  %v795_v12 = vstv %s1494_s18  ;;  %v836_v17 = vstv %s1498_s0  ;;  %s1925_s12 = sld [smem:[#allocation5 + $0x7]] }
  0xc9   :  { %v907_v18 = vstv %s1509_s2  ;;  %v826_v19 = vstv %s1497_s23  ;;  %v846_v26 = vstv %s1499_s24  ;;  %v978_v27 = vstv %s1516_s25  ;;  %s1928_s14 = sld [smem:[#allocation5 + $0x2a]] }
  0xca   :  { %v856_v15 = vstv %s1500_s26  ;;  %v342_v23 = vstv %s341_s28  ;;  %v1048_v31 = vstv %s1523_s30  ;;  %v354_v45 = vstv %s1906_s5  ;;  %s1935_s15 = sld [smem:[#allocation5 + $0x55]] }
  0xcb   :  { %v343_v36 = vmul.f32 %v342_v23, %v1822_v56  ;;  %s1940_s17 = sld [smem:[#allocation5 + $0x40]]  ;;  %v355_v52 = vmul.f32 %v354_v45, %v1822_v56 }
  0xcc   :  { %s1949_s18 = sld [smem:[#allocation5 + $0x23]] }
  0xcd   :  { %s1953_s0 = sld [smem:[#allocation5 + $0x1c]] }
  0xce   :  { %408 = vrot.lane.b32.xlu1 %v406_v58, %s1657_s13  ;;  %398 = vrot.lane.b32.xlu0 %v396_v59, %s1657_s13  ;;  %v1865_v58 = vsel %vm790_vm4, %v789_v50, %v788_v49  ;;  %v722_v59 = vmul.f32 %v721_v54, %v1808_v44  ;;  %v1078_v50 = vstv %s1526_s9  ;;  %v346_v61 = vstv %s1925_s12  ;;  %s1958_s2 = sld [smem:[#allocation5 + $0x43]] }
  0xcf   :  { %604 = vrot.lane.b32.xlu2 %v602_v60, %s1656_s6  ;;  %v793_v60 = vmul.f32 %v1865_v58, %v1793_v38  ;;  %v1878_v38 = vld [vmem:[#allocation2 + $0x6] sm:$0x3f]  ;;  %s1966_s23 = sld [smem:[#allocation5 + $0x5c]] }
  0xd0   :  { %v1049_v6 = vmul.f32 %v1048_v31, %v1878_v38  ;;  %s1969_s24 = sld [smem:[#allocation5 + $0x47]] }
  0xd1   :  { %v837_v20 = vmul.f32 %v836_v17, %v793_v60  ;;  %v847_v28 = vmul.f32 %v846_v26, %v793_v60  ;;  %s1988_s25 = sld [smem:[#allocation5 + $0x56]] }
  0xd2   :  { %s1992_s26 = sld [smem:[#allocation5 + $0x4a]] }
  0xd3   :  { %v358_v23 = vstv %s1953_s0  ;;  %s1998_s28 = sld [smem:[#allocation5 + $0x4f]] }
  0xd4   :  { %v359_v45 = vmul.f32 %v358_v23, %v1822_v56  ;;  %s2017_s30 = sld [smem:[#allocation5 + $0x5d]] }
  0xd5   :  { %s2052_s5 = sld [smem:[#allocation5 + $0x4b]] }
  0xd6   :  { %438 = vrot.lane.b32.xlu1 %v436_v2, %s1657_s13  ;;  %428 = vrot.lane.b32.xlu0 %v426_v3, %s1657_s13  ;;  %v807_v2 = vmul.f32 %v806_v62, %v793_v60  ;;  %v752_v3 = vmul.f32 %v751_v63, %v1808_v44  ;;  %v817_v44 = vmul.f32 %v816_v10, %v793_v60  ;;  %s2080_s9 = sld [smem:[#allocation5 + $0x58]] }
  0xd7   :  { %387 = vrot.lane.b32.xlu2 %v385_v4, %s1657_s13  ;;  %v1068_v4 = vstv %s1525_s16  ;;  %s1938_s16 = sld [smem:[#allocation5 + $0x3c]] }
  0xd8   :  { %v1069_v11 = vmul.f32 %v1068_v4, %v1878_v38  ;;  %s2087_s12 = sld [smem:[#allocation5 + $0x51]] }
  0xd9   :  { %s2135_s0 = sld [smem:[#allocation5 + $0x4c]] }
  0xde   :  { %472 = vrot.lane.b32.xlu1 %v470_v13, %s1658_s20  ;;  %493 = vrot.lane.b32.xlu0 %v491_v14, %s1658_s20  ;;  %v796_v13 = vmul.f32 %v795_v12, %v793_v60  ;;  %v1888_v14 = vmul.f32 %v1878_v38, %v1812_v51  ;;  %v1898_v51 = vmul.f32 %v1878_v38, %v1832_v8  ;;  %v1119_v12 = vstv %s1938_s16  ;;  %s2112_s16 = sld [smem:[#allocation5 + $0x5e]] }
  0xdf   :  { %418 = vrot.lane.b32.xlu2 %v416_v16, %s1657_s13 }
  0xe6   :  { %503 = vrot.lane.b32.xlu1 %v501_v21, %s1658_s20  ;;  %523 = vrot.lane.b32.xlu0 %v521_v22, %s1658_s20  ;;  %v908_v21 = vmul.f32 %v907_v18, %v1888_v14  ;;  %v827_v22 = vmul.f32 %v826_v19, %v793_v60  ;;  %v917_v18 = vstv %s1940_s17  ;;  %s2128_s17 = sld [smem:[#allocation5 + $0x59]] }
  0xe7   :  { %448 = vrot.lane.b32.xlu2 %v446_v24, %s1657_s13 }
  0xee   :  { %533 = vrot.lane.b32.xlu1 %v531_v5, %s1658_s20  ;;  %649 = vrot.lane.b32.xlu0 %v647_v29, %s1659_s27  ;;  %v979_v5 = vmul.f32 %v978_v27, %v1898_v51  ;;  %v857_v29 = vmul.f32 %v856_v15, %v793_v60  ;;  %v350_v60 = vstv %s1921_s10  ;;  %s2084_s10 = sld [smem:[#allocation5 + $0x45]] }
  0xef   :  { %483 = vrot.lane.b32.xlu2 %v481_v0, %s1658_s20 }
  0xf6   :  { %628 = vrot.lane.b32.xlu1 %v626_v32, %s1659_s27  ;;  %659 = vrot.lane.b32.xlu0 %v657_v33, %s1659_s27  ;;  %v988_v32 = vstv %s1517_s29  ;;  %s2013_s29 = sld [smem:[#allocation5 + $0x44]] }
  0xf7   :  { %513 = vrot.lane.b32.xlu2 %v511_v34, %s1658_s20  ;;  %v1058_v34 = vstv %s1524_s4  ;;  %s2023_s4 = sld [smem:[#allocation5 + $0x3d]] }
  0xfe   :  { %669 = vrot.lane.b32.xlu1 %v667_v39, %s1659_s27  ;;  %689 = vrot.lane.b32.xlu0 %v687_v7, %s1659_s27  ;;  %v989_v39 = vmul.f32 %v988_v32, %v1898_v51  ;;  %v1129_v32 = vstv %s1958_s2  ;;  %s2139_s2 = sld [smem:[#allocation5 + $0x31]] }
  0xff   :  { %639 = vrot.lane.b32.xlu2 %v637_v40, %s1659_s27  ;;  %v1059_v40 = vmul.f32 %v1058_v34, %v1878_v38 }
 0x106   :  { %713 = vrot.lane.b32.xlu1 %v711_v46, %s1660_s11  ;;  %734 = vrot.lane.b32.xlu0 %v732_v47, %s1660_s11  ;;  %v998_v47 = vstv %s1912_s7  ;;  %s2055_s7 = sld [smem:[#allocation5 + $0x57]] }
 0x107   :  { %679 = vrot.lane.b32.xlu2 %v677_v48, %s1659_s27  ;;  %v937_v48 = vstv %s1512_s8  ;;  %v999_v54 = vmul.f32 %v998_v47, %v1898_v51  ;;  %s2058_s8 = sld [smem:[#allocation5 + $0x3e]] }
 0x10e   :  { %744 = vrot.lane.b32.xlu1 %v742_v55, %s1660_s11  ;;  %764 = vrot.lane.b32.xlu0 %v762_v57, %s1660_s11  ;;  %v938_v55 = vmul.f32 %v937_v48, %v1888_v14 }
 0x10f   :  { %724 = vrot.lane.b32.xlu2 %v722_v59, %s1660_s11  ;;  %v1079_v59 = vmul.f32 %v1078_v50, %v1878_v38 }
 0x116   :  { %774 = vrot.lane.b32.xlu1 %v772_v1, %s1660_s11  ;;  %809 = vrot.lane.b32.xlu0 %v807_v2, %s1661_s19  ;;  %v366_v1 = vstv %s1928_s14  ;;  %v947_v2 = vstv %s1935_s15  ;;  %s2106_s14 = sld [smem:[#allocation5 + $0x52]] }
 0x117   :  { %754 = vrot.lane.b32.xlu2 %v752_v3, %s1660_s11  ;;  %v1964_v3 = vmul.f32 %v1878_v38, %v1844_v25  ;;  %s2109_s15 = sld [smem:[#allocation5 + $0x5f]] }
 0x119   :  { %v1880_v9 = vpop.permute.xlu2 %543  ;;  %v1120_v15 = vmul.f32 %v1119_v12, %v1964_v3 }
 0x11e   :  { %819 = vrot.lane.b32.xlu1 %v817_v44, %s1661_s19  ;;  %1071 = vrot.lane.b32.xlu0 %v1069_v11, %s1656_s6  ;;  %v351_v44 = vmul.f32 %v350_v60, %v1822_v56 }
 0x11f   :  { %798 = vrot.lane.b32.xlu2 %v796_v13, %s1661_s19  ;;  %v347_v13 = vmul.f32 %v346_v61, %v1822_v56 }
 0x121   :  { %v1890_v16 = vpop.permute.xlu2 %574 }
 0x126   :  { %839 = vrot.lane.b32.xlu1 %v837_v20, %s1661_s19  ;;  %910 = vrot.lane.b32.xlu0 %v908_v21, %s1657_s13  ;;  %v367_v20 = vmul.f32 %v366_v1, %v1822_v56  ;;  %v948_v21 = vmul.f32 %v947_v2, %v1888_v14  ;;  %v1139_v1 = vstv %s1992_s26  ;;  %v545_v2 = vrot.slane %v1880_v9, 2  ;;  %s2168_s26 = sld [smem:[#allocation5 + $0x46]] }
 0x127   :  { %829 = vrot.lane.b32.xlu2 %v827_v22, %s1661_s19 }
 0x129   :  { %v1900_v24 = vpop.permute.xlu2 %604 }
 0x12e   :  { %849 = vrot.lane.b32.xlu1 %v847_v28, %s1661_s19  ;;  %981 = vrot.lane.b32.xlu0 %v979_v5, %s1658_s20  ;;  %v918_v5 = vmul.f32 %v917_v18, %v1888_v14 }
 0x12f   :  { %859 = vrot.lane.b32.xlu2 %v857_v29, %s1661_s19  ;;  %v362_v29 = vstv %s1949_s18  ;;  %s2132_s18 = sld [smem:[#allocation5 + $0x60]] }
 0x130   :  { %v1908_v8 = vpop.permute.xlu1 %564  ;;  %v1910_v0 = vpop.permute.xlu0 %554 }
 0x131   :  { %v388_v30 = vpop.permute.xlu2 %387 }
 0x132   :  { %v389_v33 = vrot.slane %v388_v30, 2 }
 0x134   :  { %v391_v37 = vsel %vm390_vm5, %v388_v30, %v389_v33  ;;  %v957_v33 = vstv %s1966_s23  ;;  %s2153_s23 = sld [smem:[#allocation5 + $0x32]] }
 0x135   :  { %v1918_v7 = vadd.f32 %v391_v37, %v343_v36 }
 0x136   :  { %1051 = vrot.lane.b32.xlu1 %v1049_v6, %s1656_s6  ;;  %991 = vrot.lane.b32.xlu0 %v989_v39, %s1658_s20  ;;  %v927_v6 = vstv %s1969_s24  ;;  %v556_v39 = vrot.slane %v1910_v0, 2  ;;  %s2157_s24 = sld [smem:[#allocation5 + $0x5a]] }
 0x137   :  { %1061 = vrot.lane.b32.xlu2 %v1059_v40, %s1656_s6  ;;  %v363_v40 = vmul.f32 %v362_v29, %v1822_v56 }
 0x138   :  { %v1930_v41 = vpop.permute.xlu1 %594  ;;  %v1932_v43 = vpop.permute.xlu0 %584 }
 0x139   :  { %v419_v46 = vpop.permute.xlu2 %418  ;;  %v586_v12 = vrot.slane %v1932_v43, 2 }
 0x13a   :  { %v420_v49 = vrot.slane %v419_v46, 2 }
 0x13b   :  { %v587_v23 = vsel %vm546_vm7, %v1932_v43, %v586_v12  ;;  %v1200_v43 = vstv %s2013_s29  ;;  %s2184_s29 = sld [smem:[#allocation5 + $0x35]] }
 0x13c   :  { %v421_v53 = vsel %vm390_vm5, %v419_v46, %v420_v49  ;;  %v1130_v49 = vmul.f32 %v1129_v32, %v1964_v3  ;;  %v2048_v32 = vmul.f32 %v1878_v38, %v1803_v42 }
 0x13d   :  { %v1946_v57 = vadd.f32 %v421_v53, %v355_v52 }
 0x13e   :  { %1001 = vrot.lane.b32.xlu1 %v999_v54, %s1658_s20  ;;  %940 = vrot.lane.b32.xlu0 %v938_v55, %s1657_s13  ;;  %v958_v54 = vmul.f32 %v957_v33, %v1888_v14  ;;  %v928_v55 = vmul.f32 %v927_v6, %v1888_v14  ;;  %v1028_v33 = vstv %s2017_s30  ;;  %s2190_s30 = sld [smem:[#allocation5 + $0x38]] }
 0x13f   :  { %1081 = vrot.lane.b32.xlu2 %v1079_v59, %s1656_s6  ;;  %v557_v59 = vsel %vm546_vm7, %v1910_v0, %v556_v39  ;;  %v566_v0 = vrot.slane %v1908_v8, 2 }
 0x140   :  { %v409_v62 = vpop.permute.xlu1 %408  ;;  %v399_v63 = vpop.permute.xlu0 %398 }
 0x141   :  { %v410_v4 = vrot.slane %v409_v62, 2  ;;  %v400_v10 = vrot.slane %v399_v63, 2  ;;  %v449_v11 = vpop.permute.xlu2 %448 }
 0x142   :  { %v450_v17 = vrot.slane %v449_v11, 2 }
 0x143   :  { %v411_v19 = vsel %vm390_vm5, %v409_v62, %v410_v4  ;;  %v401_v25 = vsel %vm390_vm5, %v399_v63, %v400_v10  ;;  %v1018_v63 = vstv %s1988_s25  ;;  %s2160_s25 = sld [smem:[#allocation5 + $0x53]] }
 0x144   :  { %v413_v22 = vadd.f32 %v411_v19, %v351_v44  ;;  %v403_v26 = vadd.f32 %v401_v25, %v347_v13  ;;  %v451_v27 = vsel %vm390_vm5, %v449_v11, %v450_v17  ;;  %v1008_v13 = vstv %s1998_s28  ;;  %s2182_s28 = sld [smem:[#allocation5 + $0x33]] }
 0x145   :  { %v1980_v28 = vadd.f32 %v451_v27, %v367_v20  ;;  %v1019_v19 = vmul.f32 %v1018_v63, %v1898_v51  ;;  %v547_v27 = vsel %vm546_vm7, %v1880_v9, %v545_v2  ;;  %v1009_v29 = vmul.f32 %v1008_v13, %v1898_v51 }
 0x146   :  { %950 = vrot.lane.b32.xlu1 %v948_v21, %s1657_s13  ;;  %1122 = vrot.lane.b32.xlu0 %v1120_v15, %s1659_s27  ;;  %v567_v15 = vsel %vm546_vm7, %v1908_v8, %v566_v0  ;;  %v576_v8 = vrot.slane %v1890_v16, 2  ;;  %v1088_v2 = vstv %s2055_s7  ;;  %s2213_s7 = sld [smem:[#allocation5 + $0x36]] }
 0x147   :  { %920 = vrot.lane.b32.xlu2 %v918_v5, %s1657_s13 }
 0x148   :  { %v439_v30 = vpop.permute.xlu1 %438  ;;  %v429_v31 = vpop.permute.xlu0 %428 }
 0x149   :  { %v440_v34 = vrot.slane %v439_v30, 2  ;;  %v430_v36 = vrot.slane %v429_v31, 2  ;;  %v484_v37 = vpop.permute.xlu2 %483 }
 0x14a   :  { %v485_v46 = vrot.slane %v484_v37, 2 }
 0x14b   :  { %v441_v47 = vsel %vm390_vm5, %v439_v30, %v440_v34  ;;  %v431_v48 = vsel %vm390_vm5, %v429_v31, %v430_v36  ;;  %v596_v34 = vrot.slane %v1930_v41, 2 }
 0x14c   :  { %v2003_v50 = vadd.f32 %v441_v47, %v363_v40  ;;  %v433_v52 = vadd.f32 %v431_v48, %v359_v45  ;;  %v486_v53 = vsel %vm475_vm6, %v484_v37, %v485_v46  ;;  %v1190_v40 = vstv %s2023_s4  ;;  %s2193_s4 = sld [smem:[#allocation5 + $0x61]] }
 0x14d   :  { %v488_v56 = vadd.f32 %v486_v53, %v403_v26  ;;  %v1140_v26 = vmul.f32 %v1139_v1, %v1964_v3  ;;  %v1029_v46 = vmul.f32 %v1028_v33, %v1898_v51  ;;  %v577_v53 = vsel %vm546_vm7, %v1890_v16, %v576_v8 }
 0x14e   :  { %1132 = vrot.lane.b32.xlu1 %v1130_v49, %s1659_s27  ;;  %960 = vrot.lane.b32.xlu0 %v958_v54, %s1657_s13  ;;  %v597_v54 = vsel %vm546_vm7, %v1930_v41, %v596_v34  ;;  %v1210_v41 = vstv %s2052_s5  ;;  %s2198_s5 = sld [smem:[#allocation5 + $0x5b]] }
 0x14f   :  { %930 = vrot.lane.b32.xlu2 %v928_v55, %s1657_s13  ;;  %v559_v60 = vadd.f32 %v557_v59, %v488_v56  ;;  %v1191_v55 = vmul.f32 %v1190_v40, %v2048_v32  ;;  %v2077_v59 = vmul.f32 %v1878_v38, %v1865_v58 }
 0x150   :  { %v473_v61 = vpop.permute.xlu1 %472  ;;  %v494_v62 = vpop.permute.xlu0 %493 }
 0x151   :  { %v474_v4 = vrot.slane %v473_v61, 2  ;;  %v495_v10 = vrot.slane %v494_v62, 2  ;;  %v514_v11 = vpop.permute.xlu2 %513 }
 0x152   :  { %v515_v44 = vrot.slane %v514_v11, 2 }
 0x153   :  { %v476_v17 = vsel %vm475_vm6, %v473_v61, %v474_v4  ;;  %v496_v18 = vsel %vm475_vm6, %v494_v62, %v495_v10  ;;  %v1261_v4 = vstv %s2058_s8  ;;  %s2219_s8 = sld [smem:[#allocation5 + $0x3f]] }
 0x154   :  { %v478_v25 = vadd.f32 %v476_v17, %v1918_v7  ;;  %v498_v20 = vadd.f32 %v496_v18, %v413_v22  ;;  %v516_v21 = vsel %vm475_vm6, %v514_v11, %v515_v44  ;;  %v1211_v11 = vmul.f32 %v1210_v41, %v2048_v32 }
 0x155   :  { %v518_v5 = vadd.f32 %v516_v21, %v433_v52  ;;  %v1201_v52 = vmul.f32 %v1200_v43, %v2048_v32  ;;  %v1089_v17 = vmul.f32 %v1088_v2, %v1878_v38 }
 0x156   :  { %1021 = vrot.lane.b32.xlu1 %v1019_v19, %s1658_s20  ;;  %1142 = vrot.lane.b32.xlu0 %v1140_v26, %s1659_s27  ;;  %v569_v7 = vadd.f32 %v567_v15, %v498_v20  ;;  %v2040_v22 = vadd.f32 %v547_v27, %v478_v25  ;;  %v1262_v25 = vmul.f32 %v1261_v4, %v2077_v59  ;;  %v1159_v26 = vstv %s2080_s9  ;;  %s1505_s9 = sld [smem:[#allocation5 + $0x4d]] }
 0x157   :  { %1011 = vrot.lane.b32.xlu2 %v1009_v29, %s1658_s20  ;;  %v2043_v9 = vadd.f32 %v587_v23, %v518_v5  ;;  %v1271_v5 = vstv %s2084_s10  ;;  %v1149_v23 = vstv %s2087_s12  ;;  %v2164_v4 = vmul.f32 %v1878_v38, %v1727_v35  ;;  %s1665_s10 = smov 64   ;;  %s1666_s12 = smov 32  }
 0x158   :  { %v504_v30 = vpop.permute.xlu1 %503  ;;  %v524_v31 = vpop.permute.xlu0 %523  ;;  %v1272_v34 = vmul.f32 %v1271_v5, %v2077_v59  ;;  %v1301_v5 = vstv %s2157_s24 }
 0x159   :  { %v505_v36 = vrot.slane %v504_v30, 2  ;;  %v525_v37 = vrot.slane %v524_v31, 2  ;;  %v640_v6 = vpop.permute.xlu2 %639 }
 0x15a   :  { %v641_v39 = vrot.slane %v640_v6, 2 }
 0x15b   :  { %v506_v45 = vsel %vm475_vm6, %v504_v30, %v505_v36  ;;  %v526_v42 = vsel %vm475_vm6, %v524_v31, %v525_v37  ;;  %v1160_v30 = vmul.f32 %v1159_v26, %v1964_v3  ;;  %v1150_v37 = vmul.f32 %v1149_v23, %v1964_v3 }
 0x15c   :  { %v508_v47 = vadd.f32 %v506_v45, %v1946_v57  ;;  %v528_v48 = vadd.f32 %v526_v42, %v2003_v50  ;;  %v642_v49 = vsel %vm631_vm8, %v640_v6, %v641_v39  ;;  %v1220_v42 = vstv %s2106_s14  ;;  %s1667_s14 = smov 48  }
 0x15d   :  { %v644_v56 = vadd.f32 %v642_v49, %v559_v60  ;;  %v606_v60 = vrot.slane %v1900_v24, 2 }
 0x15e   :  { %1203 = vrot.lane.b32.xlu1 %v1201_v52, %s1660_s11  ;;  %1031 = vrot.lane.b32.xlu0 %v1029_v46, %s1658_s20  ;;  %v599_v57 = vadd.f32 %v597_v54, %v528_v48  ;;  %v579_v50 = vadd.f32 %v577_v53, %v508_v47  ;;  %v1169_v46 = vstv %s2109_s15  ;;  %v1098_v48 = vstv %s2112_s16 }
 0x15f   :  { %1193 = vrot.lane.b32.xlu2 %v1191_v55, %s1660_s11  ;;  %v607_v18 = vsel %vm546_vm7, %v1900_v24, %v606_v60  ;;  %v1170_v55 = vmul.f32 %v1169_v46, %v1964_v3 }
 0x160   :  { %v534_v16 = vpop.permute.xlu1 %533  ;;  %v650_v61 = vpop.permute.xlu0 %649 }
 0x161   :  { %v535_v62 = vrot.slane %v534_v16, 2  ;;  %v651_v63 = vrot.slane %v650_v61, 2  ;;  %v680_v1 = vpop.permute.xlu2 %679 }
 0x162   :  { %v681_v0 = vrot.slane %v680_v1, 2 }
 0x163   :  { %v536_v58 = vsel %vm475_vm6, %v534_v16, %v535_v62  ;;  %v652_v10 = vsel %vm631_vm8, %v650_v61, %v651_v63  ;;  %v1230_v63 = vstv %s2128_s17 }
 0x164   :  { %v538_v12 = vadd.f32 %v536_v58, %v1980_v28  ;;  %v2093_v44 = vadd.f32 %v652_v10, %v569_v7  ;;  %v682_v13 = vsel %vm631_vm8, %v680_v1, %v681_v0  ;;  %v1240_v1 = vstv %s2132_s18 }
 0x165   :  { %v2099_v19 = vadd.f32 %v682_v13, %v599_v57  ;;  %v1281_v0 = vstv %s2135_s0 }
 0x166   :  { %1091 = vrot.lane.b32.xlu1 %v1089_v17, %s1656_s6  ;;  %1213 = vrot.lane.b32.xlu0 %v1211_v11, %s1660_s11  ;;  %v609_v28 = vadd.f32 %v607_v18, %v538_v12  ;;  %v868_v11 = vstv %s2139_s2  ;;  %v1231_v17 = vmul.f32 %v1230_v63, %v2048_v32  ;;  %v1241_v18 = vmul.f32 %v1240_v1, %v2048_v32  ;;  %s1420_s2 = sshll.u32 %s2345_s3, 4  ;;  %s1421_s2 = int_to_ptr.hbm [resolvable:$true] %s1420_s2 }
 0x167   :  { %1264 = vrot.lane.b32.xlu2 %v1262_v25, %s1661_s19  ;;  %v1282_v35 = vmul.f32 %v1281_v0, %v2077_v59 }
 0x168   :  { %v629_v20 = vpop.permute.xlu1 %628  ;;  %v660_v21 = vpop.permute.xlu0 %659 }
 0x169   :  { %v630_v27 = vrot.slane %v629_v20, 2  ;;  %v661_v15 = vrot.slane %v660_v21, 2  ;;  %v725_v24 = vpop.permute.xlu2 %724 }
 0x16a   :  { %v726_v29 = vrot.slane %v725_v24, 2 }
 0x16b   :  { %v632_v7 = vsel %vm631_vm8, %v629_v20, %v630_v27  ;;  %v662_v8 = vsel %vm631_vm8, %v660_v21, %v661_v15  ;;  %v869_v20 = vmul.f32 %v868_v11, %v2164_v4  ;;  %v1180_v11 = vstv %s2213_s7 }
 0x16c   :  { %v634_v31 = vadd.f32 %v632_v7, %v2040_v22  ;;  %v2118_v43 = vadd.f32 %v662_v8, %v579_v50  ;;  %v727_v33 = vsel %vm716_vm9, %v725_v24, %v726_v29  ;;  %v1099_v50 = vmul.f32 %v1098_v48, %v1878_v38 }
 0x16d   :  { %v2122_v36 = vadd.f32 %v727_v33, %v644_v56  ;;  %v1221_v56 = vmul.f32 %v1220_v42, %v2048_v32  ;;  %v897_v29 = vstv %s2153_s23  ;;  %v1291_v7 = vstv %s2160_s25 }
 0x16e   :  { %1274 = vrot.lane.b32.xlu1 %v1272_v34, %s1661_s19  ;;  %1162 = vrot.lane.b32.xlu0 %v1160_v30, %s1659_s27 }
 0x16f   :  { %1152 = vrot.lane.b32.xlu2 %v1150_v37, %s1659_s27  ;;  %v1302_v37 = vmul.f32 %v1301_v5, %v2077_v59  ;;  %v884_v5 = vstv %s1505_s9 }
 0x170   :  { %v670_v6 = vpop.permute.xlu1 %669  ;;  %v690_v22 = vpop.permute.xlu0 %689 }
 0x171   :  { %v671_v39 = vrot.slane %v670_v6, 2  ;;  %v691_v40 = vrot.slane %v690_v22, 2  ;;  %v755_v45 = vpop.permute.xlu2 %754 }
 0x172   :  { %v756_v47 = vrot.slane %v755_v45, 2 }
 0x173   :  { %v672_v49 = vsel %vm631_vm8, %v670_v6, %v671_v39  ;;  %v692_v52 = vsel %vm631_vm8, %v690_v22, %v691_v40  ;;  %v898_v6 = vmul.f32 %v897_v29, %v1888_v14  ;;  %v1292_v39 = vmul.f32 %v1291_v7, %v2077_v59 }
 0x174   :  { %v674_v53 = vadd.f32 %v672_v49, %v2043_v9  ;;  %v2142_v54 = vadd.f32 %v692_v52, %v609_v28  ;;  %v757_v57 = vsel %vm716_vm9, %v755_v45, %v756_v47  ;;  %v968_v14 = vstv %s2182_s28 }
 0x175   :  { %v1109_v49 = vstv %s2184_s29  ;;  %v872_v52 = vstv %s2190_s30 }
 0x176   :  { %v2148_v16 = vadd.f32 %v757_v57, %v674_v53  ;;  %1223 = vrot.lane.b32.xlu1 %v1221_v56, %s1660_s11  ;;  %1172 = vrot.lane.b32.xlu0 %v1170_v55, %s1659_s27  ;;  %v1311_v56 = vstv %s2193_s4 }
 0x177   :  { %1101 = vrot.lane.b32.xlu2 %v1099_v50, %s1656_s6  ;;  %v969_v50 = vmul.f32 %v968_v14, %v1898_v51  ;;  %v1312_v1 = vmul.f32 %v1311_v56, %v2077_v59 }
 0x178   :  { %v714_v9 = vpop.permute.xlu1 %713  ;;  %v735_v61 = vpop.permute.xlu0 %734 }
 0x179   :  { %v715_v41 = vrot.slane %v714_v9, 2  ;;  %v736_v60 = vrot.slane %v735_v61, 2  ;;  %v799_v62 = vpop.permute.xlu2 %798 }
 0x17a   :  { %v800_v2 = vrot.slane %v799_v62, 2 }
 0x17b   :  { %v717_v58 = vsel %vm716_vm9, %v714_v9, %v715_v41  ;;  %v737_v10 = vsel %vm716_vm9, %v735_v61, %v736_v60  ;;  %v892_v9 = vstv %s2198_s5  ;;  %v1110_v60 = vmul.f32 %v1109_v49, %v1964_v3 }
 0x17c   :  { %v719_v12 = vadd.f32 %v717_v58, %v634_v31  ;;  %v2172_v13 = vadd.f32 %v737_v10, %v2093_v44  ;;  %v802_v25 = vsel %vm801_vm10, %v799_v62, %v800_v2  ;;  %v880_v31 = vstv %s2168_s26 }
 0x17d   :  { %v873_v62 = vmul.f32 %v872_v52, %v2164_v4 }
 0x17e   :  { %v804_v28 = vadd.f32 %v802_v25, %v719_v12  ;;  %1233 = vrot.lane.b32.xlu1 %v1231_v17, %s1660_s11  ;;  %1243 = vrot.lane.b32.xlu0 %v1241_v18, %s1660_s11  ;;  %v876_v12 = vstv %s2219_s8 }
 0x17f   :  { %1284 = vrot.lane.b32.xlu2 %v1282_v35, %s1661_s19  ;;  %v1181_v35 = vmul.f32 %v1180_v11, %v2048_v32 }
 0x180   :  { %v745_v44 = vpop.permute.xlu1 %744  ;;  %v765_v21 = vpop.permute.xlu0 %764  ;;  %v2186_v26 = vadd.f32 %v869_v20, %v804_v28  ;;  %v877_v28 = vmul.f32 %v876_v12, %v2164_v4 }
 0x181   :  { %v746_v27 = vrot.slane %v745_v44, 2  ;;  %v766_v15 = vrot.slane %v765_v21, 2  ;;  %v830_v24 = vpop.permute.xlu2 %829 }
 0x182   :  { %v831_v23 = vrot.slane %v830_v24, 2 }
 0x183   :  { %v747_v8 = vsel %vm716_vm9, %v745_v44, %v746_v27  ;;  %v767_v30 = vsel %vm716_vm9, %v765_v21, %v766_v15 }
 0x184   :  { %v749_v33 = vadd.f32 %v747_v8, %v2118_v43  ;;  %v2202_v34 = vadd.f32 %v767_v30, %v2099_v19  ;;  %v832_v22 = vsel %vm801_vm10, %v830_v24, %v831_v23  ;;  %v881_v43 = vmul.f32 %v880_v31, %v2164_v4 }
 0x185   :  { %v885_v23 = vmul.f32 %v884_v5, %v2164_v4 }
 0x186   :  { %v834_v40 = vadd.f32 %v832_v22, %v749_v33  ;;  %1304 = vrot.lane.b32.xlu1 %v1302_v37, %s1661_s19  ;;  %900 = vrot.lane.b32.xlu0 %v898_v6, %s1657_s13  ;;  %s2222_s13 = sld [smem:[#allocation5 + $0x34]] }
 0x187   :  { %1294 = vrot.lane.b32.xlu2 %v1292_v39, %s1661_s19 }
 0x188   :  { %v775_v19 = vpop.permute.xlu1 %774  ;;  %v810_v45 = vpop.permute.xlu0 %809  ;;  %v2215_v42 = vadd.f32 %v881_v43, %v834_v40 }
 0x189   :  { %v776_v46 = vrot.slane %v775_v19, 2  ;;  %v811_v47 = vrot.slane %v810_v45, 2  ;;  %v860_v48 = vpop.permute.xlu2 %859 }
 0x18a   :  { %v861_v53 = vrot.slane %v860_v48, 2 }
 0x18b   :  { %v777_v55 = vsel %vm716_vm9, %v775_v19, %v776_v46  ;;  %v812_v57 = vsel %vm801_vm10, %v810_v45, %v811_v47 }
 0x18c   :  { %v779_v61 = vadd.f32 %v777_v55, %v2142_v54  ;;  %v814_v41 = vadd.f32 %v812_v57, %v2122_v36  ;;  %v862_v63 = vsel %vm801_vm10, %v860_v48, %v861_v53  ;;  %v893_v36 = vmul.f32 %v892_v9, %v2164_v4 }
 0x18d   :  { %v1038_v17 = vstv %s2222_s13 }
 0x18e   :  { %v864_v2 = vadd.f32 %v862_v63, %v779_v61  ;;  %971 = vrot.lane.b32.xlu1 %v969_v50, %s1658_s20  ;;  %1112 = vrot.lane.b32.xlu0 %v1110_v60, %s1659_s27  ;;  %v2236_v51 = vadd.f32 %v873_v62, %v814_v41  ;;  %s1543_s20 = sld [smem:[#allocation5 + $0x37]]  ;;  %v1039_v20 = vmul.f32 %v1038_v17, %v1878_v38 }
 0x18f   :  { %1314 = vrot.lane.b32.xlu2 %v1312_v1, %s1661_s19  ;;  %s1506_s27 = sld [smem:[#allocation5 + $0x54]] }
 0x190   :  { %v820_v3 = vpop.permute.xlu1 %819  ;;  %v2240_v54 = vpop.permute.xlu0 %1071  ;;  %v2242_v0 = vadd.f32 %v893_v36, %v864_v2 }
 0x191   :  { %v821_v58 = vrot.slane %v820_v3, 2  ;;  %v1062_v10 = vpop.permute.xlu2 %1061  ;;  %v1073_v57 = vrot.slane %v2240_v54, 2 }
 0x192   :  { %v1063_v45 = vrot.slane %v1062_v10, 2 }
 0x193   :  { %v822_v18 = vsel %vm801_vm10, %v820_v3, %v821_v58 }
 0x194   :  { %v824_v25 = vadd.f32 %v822_v18, %v2172_v13  ;;  %v1251_v29 = vstv %s1543_s20  ;;  %v1064_v53 = vsel %vm546_vm7, %v1062_v10, %v1063_v45  ;;  %v1074_v10 = vsel %vm546_vm7, %v2240_v54, %v1073_v57 }
 0x195   :  { %v1252_v38 = vmul.f32 %v1251_v29, %v2077_v59  ;;  %v888_v37 = vstv %s1506_s27 }
 0x196   :  { %1183 = vrot.lane.b32.xlu1 %v1181_v35, %s1660_s11  ;;  %v878_v44 = vadd.f32 %v877_v28, %v824_v25  ;;  %v889_v40 = vmul.f32 %v888_v37, %v2164_v4  ;;  %s1663_s11 = smov 80  }
 0x197   :  { %1041 = vrot.lane.b32.xlu2 %v1039_v20, %s1656_s6  ;;  %s1662_s6 = smov 112  }
 0x198   :  { %v840_v21 = vpop.permute.xlu1 %839  ;;  %v911_v27 = vpop.permute.xlu0 %910 }
 0x199   :  { %v841_v15 = vrot.slane %v840_v21, 2  ;;  %v1082_v24 = vpop.permute.xlu2 %1081  ;;  %v912_v41 = vrot.slane %v911_v27, 2 }
 0x19a   :  { %v1083_v63 = vrot.slane %v1082_v24, 2 }
 0x19b   :  { %v842_v13 = vsel %vm801_vm10, %v840_v21, %v841_v15  ;;  %v913_v12 = vsel %vm390_vm5, %v911_v27, %v912_v41 }
 0x19c   :  { %v844_v32 = vadd.f32 %v842_v13, %v2148_v16  ;;  %v915_v21 = vadd.f32 %v913_v12, %v2236_v51 }
 0x19e   :  { %v886_v7 = vadd.f32 %v885_v23, %v844_v32 }
 0x19f   :  { %1254 = vrot.lane.b32.xlu2 %v1252_v38, %s1661_s19  ;;  %s1664_s19 = smov 96  }
 0x1a0   :  { %v850_v8 = vpop.permute.xlu1 %849  ;;  %v982_v30 = vpop.permute.xlu0 %981 }
 0x1a1   :  { %v851_v31 = vrot.slane %v850_v8, 2  ;;  %v921_v33 = vpop.permute.xlu2 %920  ;;  %v983_v36 = vrot.slane %v982_v30, 2 }
 0x1a2   :  { %v922_v22 = vrot.slane %v921_v33, 2 }
 0x1a3   :  { %v852_v6 = vsel %vm801_vm10, %v850_v8, %v851_v31  ;;  %v984_v35 = vsel %vm475_vm6, %v982_v30, %v983_v36 }
 0x1a4   :  { %v854_v39 = vadd.f32 %v852_v6, %v2202_v34  ;;  %v923_v43 = vsel %vm390_vm5, %v921_v33, %v922_v22  ;;  %v986_v29 = vadd.f32 %v984_v35, %v915_v21 }
 0x1a5   :  { %v925_v47 = vadd.f32 %v923_v43, %v878_v44 }
 0x1a6   :  { %v2262_v16 = vadd.f32 %v889_v40, %v854_v39 }
 0x1a8   :  { %v1052_v59 = vpop.permute.xlu1 %1051  ;;  %v992_v19 = vpop.permute.xlu0 %991 }
 0x1a9   :  { %v993_v14 = vrot.slane %v992_v19, 2  ;;  %v931_v46 = vpop.permute.xlu2 %930  ;;  %v1053_v17 = vrot.slane %v1052_v59, 2 }
 0x1aa   :  { %v932_v49 = vrot.slane %v931_v46, 2 }
 0x1ab   :  { %v994_v48 = vsel %vm475_vm6, %v992_v19, %v993_v14  ;;  %v1054_v5 = vsel %vm546_vm7, %v1052_v59, %v1053_v17 }
 0x1ac   :  { %v996_v52 = vadd.f32 %v994_v48, %v925_v47  ;;  %v933_v4 = vsel %vm390_vm5, %v931_v46, %v932_v49  ;;  %v1056_v13 = vadd.f32 %v1054_v5, %v986_v29 }
 0x1ad   :  { %v935_v60 = vadd.f32 %v933_v4, %v2215_v42  ;;  %v1084_v42 = vsel %vm546_vm7, %v1082_v24, %v1083_v63 }
 0x1ae   :  { %v2267_v56 = vadd.f32 %v1064_v53, %v996_v52 }
 0x1b0   :  { %v1002_v34 = vpop.permute.xlu1 %1001  ;;  %v941_v55 = vpop.permute.xlu0 %940 }
 0x1b1   :  { %v1003_v50 = vrot.slane %v1002_v34, 2  ;;  %v942_v9 = vrot.slane %v941_v55, 2  ;;  %v1012_v61 = vpop.permute.xlu2 %1011 }
 0x1b2   :  { %v1013_v62 = vrot.slane %v1012_v61, 2 }
 0x1b3   :  { %v1004_v1 = vsel %vm475_vm6, %v1002_v34, %v1003_v50  ;;  %v943_v2 = vsel %vm390_vm5, %v941_v55, %v942_v9 }
 0x1b4   :  { %v1006_v3 = vadd.f32 %v1004_v1, %v935_v60  ;;  %v945_v58 = vadd.f32 %v943_v2, %v886_v7  ;;  %v1014_v11 = vsel %vm475_vm6, %v1012_v61, %v1013_v62 }
 0x1b6   :  { %v1016_v18 = vadd.f32 %v1014_v11, %v945_v58  ;;  %v1076_v25 = vadd.f32 %v1074_v10, %v1006_v3 }
 0x1b8   :  { %v2280_v28 = vpop.permute.xlu1 %950  ;;  %v1123_v20 = vpop.permute.xlu0 %1122  ;;  %v2282_v44 = vadd.f32 %v1084_v42, %v1016_v18 }
 0x1b9   :  { %v1124_v15 = vrot.slane %v1123_v20, 2  ;;  %v1194_v54 = vpop.permute.xlu2 %1193  ;;  %v952_v21 = vrot.slane %v2280_v28, 2 }
 0x1ba   :  { %v1195_v32 = vrot.slane %v1194_v54, 2 }
 0x1bb   :  { %v1125_v27 = vsel %vm631_vm8, %v1123_v20, %v1124_v15 }
 0x1bc   :  { %v1127_v23 = vadd.f32 %v1125_v27, %v1056_v13  ;;  %v1196_v8 = vsel %vm716_vm9, %v1194_v54, %v1195_v32 }
 0x1be   :  { %v1198_v31 = vadd.f32 %v1196_v8, %v1127_v23 }
 0x1c0   :  { %v1133_v24 = vpop.permute.xlu1 %1132  ;;  %v961_v38 = vpop.permute.xlu0 %960 }
 0x1c1   :  { %v1265_v7 = vpop.permute.xlu2 %1264  ;;  %v1134_v46 = vrot.slane %v1133_v24, 2  ;;  %v962_v1 = vrot.slane %v961_v38, 2 }
 0x1c2   :  { %v1266_v30 = vrot.slane %v1265_v7, 2 }
 0x1c3   :  { %v1135_v55 = vsel %vm631_vm8, %v1133_v24, %v1134_v46  ;;  %v963_v11 = vsel %vm390_vm5, %v961_v38, %v962_v1  ;;  %v953_v38 = vsel %vm390_vm5, %v2280_v28, %v952_v21 }
 0x1c4   :  { %v1267_v33 = vsel %vm801_vm10, %v1265_v7, %v1266_v30  ;;  %v1137_v61 = vadd.f32 %v1135_v55, %v2267_v56  ;;  %v965_v35 = vadd.f32 %v963_v11, %v2242_v0 }
 0x1c5   :  { %v1269_v51 = vadd.f32 %v1267_v33, %v1198_v31 }
 0x1c7   :  { %1322 = vrot.lane.b32.xlu0 %v1269_v51, %s1662_s6 }
 0x1c8   :  { %v2289_v37 = vpop.permute.xlu1 %1021  ;;  %v1143_v6 = vpop.permute.xlu0 %1142 }
 0x1c9   :  { %v1153_v22 = vpop.permute.xlu2 %1152  ;;  %v1144_v59 = vrot.slane %v1143_v6, 2  ;;  %v1023_v13 = vrot.slane %v2289_v37, 2 }
 0x1ca   :  { %v1154_v2 = vrot.slane %v1153_v22, 2 }
 0x1cb   :  { %v1145_v19 = vsel %vm631_vm8, %v1143_v6, %v1144_v59  ;;  %v1024_v33 = vsel %vm475_vm6, %v2289_v37, %v1023_v13 }
 0x1cc   :  { %v1147_v49 = vadd.f32 %v1145_v19, %v1076_v25  ;;  %v1155_v12 = vsel %vm631_vm8, %v1153_v22, %v1154_v2 }
 0x1cd   :  { %v1157_v20 = vadd.f32 %v1155_v12, %v2282_v44 }
 0x1d0   :  { %v1204_v39 = vpop.permute.xlu1 %1203  ;;  %v1032_v40 = vpop.permute.xlu0 %1031 }
 0x1d1   :  { %v1102_v43 = vpop.permute.xlu2 %1101  ;;  %v1205_v53 = vrot.slane %v1204_v39, 2  ;;  %v1033_v10 = vrot.slane %v1032_v40, 2 }
 0x1d2   :  { %v1103_v15 = vrot.slane %v1102_v43, 2 }
 0x1d3   :  { %v1206_v9 = vsel %vm716_vm9, %v1204_v39, %v1205_v53  ;;  %v1034_v18 = vsel %vm475_vm6, %v1032_v40, %v1033_v10  ;;  %v955_v39 = vadd.f32 %v953_v38, %v2262_v16 }
 0x1d4   :  { %v1208_v63 = vadd.f32 %v1206_v9, %v1137_v61  ;;  %v1036_v29 = vadd.f32 %v1034_v18, %v965_v35  ;;  %v1104_v0 = vsel %vm546_vm7, %v1102_v43, %v1103_v15 }
 0x1d5   :  { %v1026_v19 = vadd.f32 %v1024_v33, %v955_v39 }
 0x1d6   :  { %v1106_v8 = vadd.f32 %v1104_v0, %v1036_v29 }
 0x1d8   :  { %v2292_v45 = vpop.permute.xlu1 %1091  ;;  %v1214_v14 = vpop.permute.xlu0 %1213 }
 0x1d9   :  { %v1215_v47 = vrot.slane %v1214_v14, 2  ;;  %v1285_v48 = vpop.permute.xlu2 %1284  ;;  %v1093_v44 = vrot.slane %v2292_v45, 2 }
 0x1da   :  { %v1286_v52 = vrot.slane %v1285_v48, 2 }
 0x1db   :  { %v1216_v4 = vsel %vm716_vm9, %v1214_v14, %v1215_v47  ;;  %v1094_v40 = vsel %vm546_vm7, %v2292_v45, %v1093_v44 }
 0x1dc   :  { %v1218_v34 = vadd.f32 %v1216_v4, %v1147_v49  ;;  %v1287_v57 = vsel %vm801_vm10, %v1285_v48, %v1286_v52  ;;  %v1096_v48 = vadd.f32 %v1094_v40, %v1026_v19 }
 0x1de   :  { %v1289_v50 = vadd.f32 %v1287_v57, %v1218_v34 }
 0x1e0   :  { %v1275_v41 = vpop.permute.xlu1 %1274  ;;  %v1163_v60 = vpop.permute.xlu0 %1162  ;;  %1338 = vrot.lane.b32.xlu2 %v1289_v50, %s1663_s11 }
 0x1e1   :  { %v1276_v62 = vrot.slane %v1275_v41, 2  ;;  %v1295_v58 = vpop.permute.xlu2 %1294  ;;  %v1164_v51 = vrot.slane %v1163_v60, 2 }
 0x1e2   :  { %v1296_v25 = vrot.slane %v1295_v58, 2 }
 0x1e3   :  { %v1277_v36 = vsel %vm801_vm10, %v1275_v41, %v1276_v62  ;;  %v1165_v46 = vsel %vm631_vm8, %v1163_v60, %v1164_v51 }
 0x1e4   :  { %v1279_v3 = vadd.f32 %v1277_v36, %v1208_v63  ;;  %v1297_v32 = vsel %vm801_vm10, %v1295_v58, %v1296_v25  ;;  %v1167_v52 = vadd.f32 %v1165_v46, %v1096_v48 }
 0x1e6   :  { %1330 = vrot.lane.b32.xlu1 %v1279_v3, %s1664_s19 }
 0x1e8   :  { %v1224_v56 = vpop.permute.xlu1 %1223  ;;  %v1173_v17 = vpop.permute.xlu0 %1172 }
 0x1e9   :  { %v1225_v42 = vrot.slane %v1224_v56, 2  ;;  %v1174_v5 = vrot.slane %v1173_v17, 2  ;;  %v1315_v23 = vpop.permute.xlu2 %1314 }
 0x1ea   :  { %v1316_v6 = vrot.slane %v1315_v23, 2 }
 0x1eb   :  { %v1226_v54 = vsel %vm716_vm9, %v1224_v56, %v1225_v42  ;;  %v1175_v7 = vsel %vm631_vm8, %v1173_v17, %v1174_v5 }
 0x1ec   :  { %v1228_v27 = vadd.f32 %v1226_v54, %v1157_v20  ;;  %v1177_v28 = vadd.f32 %v1175_v7, %v1106_v8  ;;  %v1317_v47 = vsel %vm801_vm10, %v1315_v23, %v1316_v6 }
 0x1ee   :  { %v1299_v24 = vadd.f32 %v1297_v32, %v1228_v27 }
 0x1f0   :  { %v1234_v30 = vpop.permute.xlu1 %1233  ;;  %v1244_v31 = vpop.permute.xlu0 %1243  ;;  %1346 = vrot.lane.b32.xlu0 %v1299_v24, %s1665_s10 }
 0x1f1   :  { %v1245_v22 = vrot.slane %v1244_v31, 2  ;;  %v1235_v43 = vrot.slane %v1234_v30, 2  ;;  %v1042_v61 = vpop.permute.xlu2 %1041 }
 0x1f2   :  { %v1043_v1 = vrot.slane %v1042_v61, 2 }
 0x1f3   :  { %v1246_v59 = vsel %vm716_vm9, %v1244_v31, %v1245_v22  ;;  %v1236_v49 = vsel %vm716_vm9, %v1234_v30, %v1235_v43 }
 0x1f4   :  { %v1248_v14 = vadd.f32 %v1246_v59, %v1177_v28  ;;  %v1238_v4 = vadd.f32 %v1236_v49, %v1167_v52  ;;  %v1044_v3 = vsel %vm546_vm7, %v1042_v61, %v1043_v1  ;;  %v1370_v28 = vstv %s2343_s1  ;;  %s1668_s1 = smov [#allocation10]  }
 0x1f5   :  { %s1418_s17 = sshll.u32 %s1668_s1, 4  ;;  %s1419_s17 = int_to_ptr.vmem [resolvable:$true] %s1418_s17 }
 0x1f6   :  { %v1319_v37 = vadd.f32 %v1317_v47, %v1248_v14 }
 0x1f8   :  { %v1305_v53 = vpop.permute.xlu1 %1304  ;;  %1362 = vrot.lane.b32.xlu2 %v1319_v37, %s1666_s12  ;;  %v901_v55 = vpop.permute.xlu0 %900 }
 0x1f9   :  { %v1306_v16 = vrot.slane %v1305_v53, 2  ;;  %v902_v50 = vrot.slane %v901_v55, 2  ;;  %v1255_v11 = vpop.permute.xlu2 %1254 }
 0x1fa   :  { %v1256_v35 = vrot.slane %v1255_v11, 2 }
 0x1fb   :  { %v1307_v45 = vsel %vm801_vm10, %v1305_v53, %v1306_v16  ;;  %v903_v41 = vsel %vm390_vm5, %v901_v55, %v902_v50 }
 0x1fc   :  { %v1309_v34 = vadd.f32 %v1307_v45, %v1238_v4  ;;  %v905_v62 = vadd.f32 %v903_v41, %v2186_v26  ;;  %v1257_v54 = vsel %vm801_vm10, %v1255_v11, %v1256_v35 }
 0x1fe   :  { %1354 = vrot.lane.b32.xlu1 %v1309_v34, %s1667_s14 }
 0x200   :  { %v972_v57 = vpop.permute.xlu1 %971  ;;  %v1113_v63 = vpop.permute.xlu0 %1112 }
 0x201   :  { %v973_v9 = vrot.slane %v972_v57, 2  ;;  %v1114_v58 = vrot.slane %v1113_v63, 2 }
 0x203   :  { %v974_v60 = vsel %vm475_vm6, %v972_v57, %v973_v9  ;;  %v1115_v17 = vsel %vm631_vm8, %v1113_v63, %v1114_v58  ;;  %v1393_v9 = vld [vmem:[#allocation9] sm:$0xff] }
 0x204   :  { %v976_v2 = vadd.f32 %v974_v60, %v905_v62  ;;  %v1404_v60 = vld [vmem:[#allocation9 + $0x8] sm:$0xff] }
 0x206   :  { %v1046_v12 = vadd.f32 %v1044_v3, %v976_v2 }
 0x208   :  { %v1184_v36 = vpop.permute.xlu1 %1183  ;;  %v1117_v25 = vadd.f32 %v1115_v17, %v1046_v12 }
 0x209   :  { %v1185_v10 = vrot.slane %v1184_v36, 2 }
 0x20b   :  { %v1186_v18 = vsel %vm716_vm9, %v1184_v36, %v1185_v10 }
 0x20c   :  { %v1188_v26 = vadd.f32 %v1186_v18, %v1117_v25 }
 0x20e   :  { %v1259_v29 = vadd.f32 %v1257_v54, %v1188_v26 }
 0x239   :  { %v1323_v56 = vpop.permute.xlu0 %1322 }
 0x23a   :  { %v1324_v20 = vrot.slane %v1323_v56, 2  ;;  %v1339_v15 = vpop.permute.xlu2 %1338 }
 0x23b   :  { %v1340_v23 = vrot.slane %v1339_v15, 2 }
 0x23c   :  { %v1326_v5 = vsel %vm1325_vm11, %v1323_v56, %v1324_v20 }
 0x23d   :  { %v1328_v32 = vadd.f32 %v1326_v5, %v1259_v29  ;;  %v1342_v44 = vsel %vm1341_vm13, %v1339_v15, %v1340_v23 }
 0x252   :  { %v1363_v0 = vpop.permute.xlu2 %1362 }
 0x253   :  { %v1364_v31 = vrot.slane %v1363_v0, 2 }
 0x255   :  { %v1366_v39 = vsel %vm1365_vm15, %v1363_v0, %v1364_v31 }
 0x258   :  { %v1331_v42 = vpop.permute.xlu1 %1330 }
 0x259   :  { %v1332_v21 = vrot.slane %v1331_v42, 2 }
 0x25b   :  { %v1334_v13 = vsel %vm1333_vm12, %v1331_v42, %v1332_v21 }
 0x25c   :  { %v1336_v38 = vadd.f32 %v1334_v13, %v1328_v32 }
 0x25e   :  { %v1344_v8 = vadd.f32 %v1342_v44, %v1336_v38 }
 0x262   :  { %v1347_v27 = vpop.permute.xlu0 %1346 }
 0x263   :  { %v1348_v24 = vrot.slane %v1347_v27, 2 }
 0x265   :  { %v1350_v7 = vsel %vm1349_vm14, %v1347_v27, %v1348_v24 }
 0x266   :  { %v1352_v51 = vadd.f32 %v1350_v7, %v1344_v8 }
 0x270   :  { %v1355_v30 = vpop.permute.xlu1 %1354 }
 0x271   :  { %v1356_v33 = vrot.slane %v1355_v30, 2 }
 0x273   :  { %v1358_v6 = vsel %vm1357_vm0, %v1355_v30, %v1356_v33 }
 0x274   :  { %v1360_v22 = vadd.f32 %v1358_v6, %v1352_v51 }
 0x276   :  { %v1368_v40 = vadd.f32 %v1366_v39, %v1360_v22 }
 0x278   :  { %v1371_v43 = vadd.f32 %v1370_v28, %v1368_v40 }
 0x27a   :  { %v1550_v59 = vmul.f32 -1.442695, %v1371_v43 }
 0x27c   :  { %1575 = vpow2.f32 %v1550_v59 }
 0x282   :  { %v1576_v19 = vpop.eup %1575 }
 0x283   :  { %v1375_v14 = vadd.f32 1.0, %v1576_v19 }
 0x285   :  { %1577 = vrcp.f32 %v1375_v14  ;;  %v1387_v37 = vand.u32 2147483648, %v1375_v14  ;;  %v1385_v52 = vand.u32 2147483647, %v1375_v14  ;;  %vm1381_vm3 = vweird.f32 %v1375_v14 }
 0x287   :  { %v1388_v16 = vor.u32 1.1754944e-38, %v1387_v37  ;;  %vm1386_vm5 = vcmp.eq.f32.partialorder %v1385_v52, 8.507059e+37 }
 0x28b   :  { %v1578_v46 = vpop.eup %1577 }
 0x28c   :  { %v1377_v47 = vmul.f32 %v1578_v46, %v1375_v14  ;;  %vm1382_vm2 = vweird.f32 %v1578_v46 }
 0x28d   :  { %vm1383_vm4 = vmor %vm1381_vm3, %vm1382_vm2 }
 0x28e   :  { %v1378_v48 = vsub.f32 1.0, %v1377_v47 }
 0x290   :  { %v1379_v49 = vmul.f32 %v1578_v46, %v1378_v48 }
 0x292   :  { %v1380_v53 = vadd.f32 %v1578_v46, %v1379_v49 }
 0x294   :  { %v1384_v4 = vsel %vm1383_vm4, %v1578_v46, %v1380_v53 }
 0x295   :  { %v1389_v45 = vsel %vm1386_vm5, %v1388_v16, %v1384_v4 }
 0x296   :  { %1391 = vst [vmem:[#allocation3] sm:$0xf] %v1389_v45 }
 0x29d   :  { %v1392_v34 = vld [vmem:[#allocation3] ss:$2 sm:$0x3]  ;;  %v1403_v55 = vld [vmem:[#allocation3 + $0x1] ss:$2 sm:$0x3] }
 0x29e   :  { %v1396_v57 = vperm.slane %v1392_v34, 1  ;;  %v1407_v50 = vperm.slane %v1403_v55, 1  ;;  %v1395_v61 = vperm.slane %v1392_v34, 0  ;;  %v1406_v62 = vperm.slane %v1403_v55, 0 }
 0x2a0   :  { %v1397_v41 = vrot.slane %v1396_v57, 4  ;;  %v1408_v63 = vrot.slane %v1407_v50, 4 }
 0x2a2   :  { %v1398_v1 = vsel %vm59_vm1, %v1395_v61, %v1397_v41  ;;  %v1409_v2 = vsel %vm59_vm1, %v1406_v62, %v1408_v63 }
 0x2a3   :  { %v1400_v36 = vmul.f32 %v1398_v1, %v1393_v9  ;;  %v1411_v3 = vmul.f32 %v1409_v2, %v1404_v60 }
 0x2a5   :  { %1401 = vst [vmem:[#allocation10] sm:$0xff] %v1400_v36 }
 0x2a6   :  { %1413 = vst [vmem:[#allocation10 + $0x8] sm:$0xff] %v1411_v3 }
 0x2a7   :  { %1426 = dma.vmem_to_hbm [thread:$0]  %s1419_s17, 256, %s1421_s2, [#allocation7], %s1647_s21, %s1647_s21, %s1648_s22  }
 0x2a8   :  { %1643 = dma.done.wait [#allocation7], 256  }
 0x2a9   :  { %1644 = vsyncadd [#allocation7], 4294967040 }
 0x2aa   :  { %1431 = vsyncpa [#allocation6], 1 }
 0x2ab   :  { %1432 = vsyncpa [#allocation7], 1 }
 0x2ac   :  { %1433 = vsyncpa [#allocation8], 1 }

</bundles_post_ra>
